<compile_context>
chip_gen: v7x
topology: tpu7x:2x2x1
jax: 0.10.0
libtpu: 0.0.40
codegen_flags: <defaults>
</compile_context>

<pallas_src>
import functools
import math

import jax
import jax.numpy as jnp
from jax.experimental import pallas as pl
from jax.experimental.pallas import tpu as pltpu  # noqa: F401  (kept for scratch/params if scaled up)

# TODO(synk): TemplateParser / HuggingFace tokenizer has no Pallas equivalent;
# we start from pre-tokenized int32 ids.

# ----------------------------- config ---------------------------------------
VOCAB = 64
MAX_POS = 16
D = 32          # hidden
H = 2           # heads
DH = D // H     # head dim
FFN = 64
LAYERS = 2
LN_EPS = 1e-12  # BERT/GTE LayerNorm eps

# Rows of the packed per-layer vector slab `vecs` (LAYERS, N_VEC_ROWS, VEC_W).
# All rows start at lane 0 (zero-padded to VEC_W) so in-kernel reads are
# cheap sub-extent slices, never lane-offset shuffles.
ROW_BQKV = 0            # rows 0..5: qkv bias for (head hh, j in {Q,K,V}) at row hh*3+j, width DH
ROW_BO = 6              # attention output-projection bias, width D
ROW_B1 = 7              # FFN in bias, width FFN
ROW_B2 = 8              # FFN out bias, width D
ROW_LN1G, ROW_LN1B = 9, 10
ROW_LN2G, ROW_LN2B = 11, 12
ROW_EMB_G, ROW_EMB_B = 13, 14   # embedding LayerNorm (stored in layer 0's slab only)
N_VEC_ROWS = 16         # padded to a sublane multiple
VEC_W = FFN             # widest packed vector (b1)


# ----------------------------- in-kernel helpers -----------------------------
def _layernorm(x, gamma, beta):
    mu = jnp.mean(x, axis=-1, keepdims=True)
    var = jnp.mean(jnp.square(x - mu), axis=-1, keepdims=True)
    return (x - mu) * jax.lax.rsqrt(var + LN_EPS) * gamma + beta


def _gelu_erf(x):
    """Exact (erf) GELU as used by HF BERT/GTE, built from exp + polynomial
    (Abramowitz-Stegun 7.1.26, |err| < 1.5e-7) so it lowers cleanly in Mosaic."""
    z = x * (1.0 / math.sqrt(2.0))
    a = jnp.abs(z)
    t = 1.0 / (1.0 + 0.3275911 * a)
    poly = t * (0.254829592 + t * (-0.284496736 + t * (1.421413741
               + t * (-1.453152027 + t * 1.061405429))))
    erf_a = 1.0 - poly * jnp.exp(-a * a)
    erf_z = jnp.where(z < 0.0, -erf_a, erf_a)
    return 0.5 * x * (1.0 + erf_z)


# ----------------------------- fused kernel ----------------------------------
def _gte_kernel(x_ref, masks_ref, wqkv_ref, wo_ref, w1_ref, w2_ref, vecs_ref,
                out_ref, *, batch, tokens):
    """Whole-batch encoder + masked mean pooling in one invocation.

    x_ref:    (B*S, D)        word+pos+type embeddings (pre-summed in glue)
    masks_ref:(B*S + B, B*S)  rows 0..B*S-1 = block-diag additive attn bias,
                              rows B*S..    = block-diag pooling weights
    wqkv_ref: (LAYERS*H*3, D, DH)   per-(layer, head, q/k/v) projection
    wo_ref:   (LAYERS*H, DH, D)     per-(layer, head) output projection
    w1_ref:   (LAYERS, D, FFN), w2_ref: (LAYERS, FFN, D)
    vecs_ref: (LAYERS, N_VEC_ROWS, VEC_W)  packed biases / LN params
    out_ref:  (B, D)
    """
    scale = 1.0 / math.sqrt(DH)

    attn_bias = masks_ref[0:tokens, :]               # (BS, BS), 0 or -1e9
    pool_w = masks_ref[tokens:tokens + batch, :]     # (B, BS),  0/1 mask spread block-diag
    # NOTE: a fully-padded sequence would softmax uniformly over its (all
    # -1e9-biased) keys; its pooled output is still 0 because its pool_w row
    # is all-zero, so the garbage never leaves the kernel.

    # embeddings: (word + position + token_type) summed in glue -> LayerNorm here
    v0 = vecs_ref[0]                                 # layer-0 slab also carries emb LN
    x = _layernorm(x_ref[...], v0[ROW_EMB_G:ROW_EMB_G + 1, 0:D],
                   v0[ROW_EMB_B:ROW_EMB_B + 1, 0:D])

    for li in range(LAYERS):                         # static unroll; weights stay in VMEM
        vl = vecs_ref[li]                            # (N_VEC_ROWS, VEC_W)

        # ---- attention: per-(head, q/k/v) matmuls; every output is a whole
        # tile starting at lane 0 (no lane-misaligned slices). Output
        # projection folded per head: sum_h ctx_h @ wo_h == concat(ctx) @ Wo.
        attn = vl[ROW_BO:ROW_BO + 1, 0:D]            # start accumulator with bo (broadcasts)
        for hh in range(H):
            wbase = li * (H * 3) + hh * 3
            rbase = ROW_BQKV + hh * 3
            q = (jnp.dot(x, wqkv_ref[wbase + 0], preferred_element_type=jnp.float32)
                 + vl[rbase + 0:rbase + 1, 0:DH])                      # (BS, DH)
            k = (jnp.dot(x, wqkv_ref[wbase + 1], preferred_element_type=jnp.float32)
                 + vl[rbase + 1:rbase + 2, 0:DH])                      # (BS, DH)
            v = (jnp.dot(x, wqkv_ref[wbase + 2], preferred_element_type=jnp.float32)
                 + vl[rbase + 2:rbase + 3, 0:DH])                      # (BS, DH)

            s = jax.lax.dot_general(q, k, (((1,), (1,)), ((), ())),
                                    preferred_element_type=jnp.float32) * scale
            s = s + attn_bias                                          # (BS, BS)
            s = s - jnp.max(s, axis=-1, keepdims=True)
            p = jnp.exp(s)
            p = p / jnp.sum(p, axis=-1, keepdims=True)                 # exact div (parity)
            ctx = jnp.dot(p, v, preferred_element_type=jnp.float32)    # (BS, DH)
            attn = attn + jnp.dot(ctx, wo_ref[li * H + hh],
                                  preferred_element_type=jnp.float32)  # (BS, D)

        x = _layernorm(attn + x, vl[ROW_LN1G:ROW_LN1G + 1, 0:D],
                       vl[ROW_LN1B:ROW_LN1B + 1, 0:D])                 # post-LN residual

        # ---- FFN ----
        ff = jnp.dot(x, w1_ref[li], preferred_element_type=jnp.float32) + vl[ROW_B1:ROW_B1 + 1, 0:FFN]
        ff = _gelu_erf(ff)
        ff = jnp.dot(ff, w2_ref[li], preferred_element_type=jnp.float32) + vl[ROW_B2:ROW_B2 + 1, 0:D]
        x = _layernorm(ff + x, vl[ROW_LN2G:ROW_LN2G + 1, 0:D],
                       vl[ROW_LN2B:ROW_LN2B + 1, 0:D])

    # ---- TemplatePooling: masked mean pooling as (B, BS) @ (BS, D) matmul ----
    num = jnp.dot(pool_w, x, preferred_element_type=jnp.float32)       # (B, D)
    den = jnp.maximum(jnp.sum(pool_w, axis=-1, keepdims=True), 1.0)    # (B, 1)
    out_ref[...] = (num / den).astype(out_ref.dtype)                   # exact div (parity)


# ----------------------------- params ----------------------------------------
def init_params(key):
    ks = jax.random.split(key, 11)
    sc = 0.02

    def rnd(k, shape):
        return sc * jax.random.normal(k, shape, jnp.float32)

    word_emb = rnd(ks[0], (VOCAB, D))
    pos_emb = rnd(ks[1], (MAX_POS, D))
    type_emb = rnd(ks[2], (1, D))        # token_type_id == 0 row (BERT/GTE adds it)

    # logical (HF-style) layouts
    wqkv_full = rnd(ks[3], (LAYERS, D, 3 * D))   # columns = [Wq | Wk | Wv], head h at cols h*DH:(h+1)*DH
    bqkv_full = rnd(ks[4], (LAYERS, 3 * D))
    wo_full = rnd(ks[5], (LAYERS, D, D))         # rows h*DH:(h+1)*DH = head h context dims
    bo = rnd(ks[6], (LAYERS, D))
    w1 = rnd(ks[7], (LAYERS, D, FFN))
    b1 = rnd(ks[8], (LAYERS, FFN))
    w2 = rnd(ks[9], (LAYERS, FFN, D))
    b2 = rnd(ks[10], (LAYERS, D))

    # ---- repack into kernel layout (per-head, whole-tile matmul operands) ----
    wqkv = (wqkv_full.reshape(LAYERS, D, 3, H, DH)
            .transpose(0, 3, 2, 1, 4)                 # (L, H, 3, D, DH)
            .reshape(LAYERS * H * 3, D, DH))          # flat index = li*6 + hh*3 + j
    wo = wo_full.reshape(LAYERS * H, DH, D)           # flat index = li*2 + hh

    bqkv_h = bqkv_full.reshape(LAYERS, 3, H, DH).transpose(0, 2, 1, 3)   # (L, H, 3, DH)

    vecs = jnp.zeros((LAYERS, N_VEC_ROWS, VEC_W), jnp.float32)
    vecs = vecs.at[:, ROW_BQKV:ROW_BQKV + H * 3, 0:DH].set(bqkv_h.reshape(LAYERS, H * 3, DH))
    vecs = vecs.at[:, ROW_BO, 0:D].set(bo)
    vecs = vecs.at[:, ROW_B1, 0:FFN].set(b1)
    vecs = vecs.at[:, ROW_B2, 0:D].set(b2)
    vecs = vecs.at[:, ROW_LN1G, 0:D].set(1.0)         # LN gammas = 1, betas = 0 (standard init)
    vecs = vecs.at[:, ROW_LN2G, 0:D].set(1.0)
    vecs = vecs.at[0, ROW_EMB_G, 0:D].set(1.0)        # emb LN lives in layer-0 slab

    return {"word_emb": word_emb, "pos_emb": pos_emb, "type_emb": type_emb,
            "wqkv": wqkv, "wo": wo, "w1": w1, "w2": w2, "vecs": vecs}


# ----------------------------- forward ----------------------------------------
def gte_embedder_forward(params, input_ids, attention_mask):
    """input_ids: (B, S) int32, attention_mask: (B, S) {0,1} -> (B, D) embeddings."""
    b, s = input_ids.shape
    bs = b * s

    # glue: embedding-table gather + static position / token-type adds
    tok = jnp.take(params["word_emb"], input_ids, axis=0)             # (B, S, D)
    x = (tok + params["pos_emb"][:s][None, :, :] + params["type_emb"]).reshape(bs, D)

    # glue: block-diagonal attention bias + pooling weights (layout plumbing)
    m = attention_mask.astype(jnp.float32)                            # (B, S)
    bid = jnp.repeat(jnp.arange(b), s)                                # (BS,) batch id per row
    same = bid[:, None] == bid[None, :]
    keyok = (m.reshape(-1) > 0.5)[None, :]
    attn_bias = jnp.where(same & keyok, 0.0, -1e9).astype(jnp.float32)    # (BS, BS)
    pool_w = jnp.where(jnp.arange(b)[:, None] == bid[None, :],
                       m.reshape(-1)[None, :], 0.0).astype(jnp.float32)   # (B, BS)
    masks = jnp.concatenate([attn_bias, pool_w], axis=0)              # (BS + B, BS)

    kernel = functools.partial(_gte_kernel, batch=b, tokens=bs)
    # Grid-less call: single invocation, every operand mapped whole into VMEM
    # (total < 0.5 MiB) — no per-step pipeline overhead, no double buffers.
    out = pl.pallas_call(
        kernel,
        out_shape=jax.ShapeDtypeStruct((b, D), jnp.float32),
    )(x, masks, params["wqkv"], params["wo"], params["w1"], params["w2"], params["vecs"])
    return out


# ----------------------------- main ------------------------------------------
if __name__ == "__main__":
    key = jax.random.PRNGKey(0)
    pkey, ikey = jax.random.split(key)
    params = init_params(pkey)

    B, S = 2, 8
    input_ids = jax.random.randint(ikey, (B, S), 0, VOCAB, dtype=jnp.int32)
    attention_mask = jnp.array(
        [[1, 1, 1, 1, 1, 1, 1, 1],
         [1, 1, 1, 1, 1, 0, 0, 0]], dtype=jnp.int32)

    fwd = jax.jit(gte_embedder_forward)
    out = fwd(params, input_ids, attention_mask)
    out = jax.block_until_ready(out)
    assert out.shape == (B, D) and bool(jnp.all(jnp.isfinite(out)))
    print("KERNEL_OK")
</pallas_src>

<mosaic_0001>
module attributes {stable_mosaic.version = 11 : i64} {
  func.func @_gte_kernel(%arg0: memref<16x32xf32, #tpu.memory_space<vmem>>, %arg1: memref<18x16xf32, #tpu.memory_space<vmem>>, %arg2: memref<12x32x16xf32, #tpu.memory_space<vmem>>, %arg3: memref<4x16x32xf32, #tpu.memory_space<vmem>>, %arg4: memref<2x32x64xf32, #tpu.memory_space<vmem>>, %arg5: memref<2x64x32xf32, #tpu.memory_space<vmem>>, %arg6: memref<2x16x64xf32, #tpu.memory_space<vmem>>, %arg7: memref<2x32xf32, #tpu.memory_space<vmem>>) attributes {dimension_semantics = [], scalar_prefetch = 0 : i64, scratch_operands = 0 : i64, tpu.core_type = #tpu.core_type<tc>} {
    %c0 = arith.constant 0 : index
    %c0_0 = arith.constant 0 : index
    %0 = vector.load %arg1[%c0, %c0_0] : memref<18x16xf32, #tpu.memory_space<vmem>>, vector<16x16xf32>
    %c16 = arith.constant 16 : index
    %c0_1 = arith.constant 0 : index
    %1 = vector.load %arg1[%c16, %c0_1] : memref<18x16xf32, #tpu.memory_space<vmem>>, vector<2x16xf32>
    %c0_2 = arith.constant 0 : index
    %c0_3 = arith.constant 0 : index
    %c0_4 = arith.constant 0 : index
    %2 = vector.load %arg6[%c0_2, %c0_3, %c0_4] : memref<2x16x64xf32, #tpu.memory_space<vmem>>, vector<1x16x64xf32>
    %3 = vector.shape_cast %2 : vector<1x16x64xf32> to vector<16x64xf32>
    %c0_5 = arith.constant 0 : index
    %c0_6 = arith.constant 0 : index
    %4 = vector.load %arg0[%c0_5, %c0_6] : memref<16x32xf32, #tpu.memory_space<vmem>>, vector<16x32xf32>
    %5 = vector.extract_strided_slice %3 {offsets = [13, 0], sizes = [1, 32], strides = [1, 1]} : vector<16x64xf32> to vector<1x32xf32>
    %6 = vector.extract_strided_slice %3 {offsets = [14, 0], sizes = [1, 32], strides = [1, 1]} : vector<16x64xf32> to vector<1x32xf32>
    %cst = arith.constant dense<0.000000e+00> : vector<16xf32>
    %7 = vector.multi_reduction <add>, %4, %cst [1] : vector<16x32xf32> to vector<16xf32>
    %8 = vector.shape_cast %7 : vector<16xf32> to vector<16x1xf32>
    %cst_7 = arith.constant 3.200000e+01 : f32
    %9 = vector.broadcast %cst_7 : f32 to vector<16x1xf32>
    %10 = arith.divf %8, %9 : vector<16x1xf32>
    %11 = vector.broadcast %10 : vector<16x1xf32> to vector<16x32xf32>
    %12 = arith.subf %4, %11 : vector<16x32xf32>
    %13 = arith.mulf %12, %12 : vector<16x32xf32>
    %cst_8 = arith.constant dense<0.000000e+00> : vector<16xf32>
    %14 = vector.multi_reduction <add>, %13, %cst_8 [1] : vector<16x32xf32> to vector<16xf32>
    %15 = vector.shape_cast %14 : vector<16xf32> to vector<16x1xf32>
    %cst_9 = arith.constant 3.200000e+01 : f32
    %16 = vector.broadcast %cst_9 : f32 to vector<16x1xf32>
    %17 = arith.divf %15, %16 : vector<16x1xf32>
    %18 = vector.broadcast %10 : vector<16x1xf32> to vector<16x32xf32>
    %19 = arith.subf %4, %18 : vector<16x32xf32>
    %cst_10 = arith.constant 9.99999996E-13 : f32
    %20 = vector.broadcast %cst_10 : f32 to vector<16x1xf32>
    %21 = arith.addf %17, %20 : vector<16x1xf32>
    %22 = math.rsqrt %21 : vector<16x1xf32>
    %23 = vector.broadcast %22 : vector<16x1xf32> to vector<16x32xf32>
    %24 = arith.mulf %19, %23 : vector<16x32xf32>
    %25 = vector.broadcast %5 : vector<1x32xf32> to vector<16x32xf32>
    %26 = arith.mulf %24, %25 : vector<16x32xf32>
    %27 = vector.broadcast %6 : vector<1x32xf32> to vector<16x32xf32>
    %28 = arith.addf %26, %27 : vector<16x32xf32>
    %c0_11 = arith.constant 0 : index
    %c0_12 = arith.constant 0 : index
    %c0_13 = arith.constant 0 : index
    %29 = vector.load %arg6[%c0_11, %c0_12, %c0_13] : memref<2x16x64xf32, #tpu.memory_space<vmem>>, vector<1x16x64xf32>
    %30 = vector.shape_cast %29 : vector<1x16x64xf32> to vector<16x64xf32>
    %31 = vector.extract_strided_slice %30 {offsets = [6, 0], sizes = [1, 32], strides = [1, 1]} : vector<16x64xf32> to vector<1x32xf32>
    %c0_14 = arith.constant 0 : index
    %c0_15 = arith.constant 0 : index
    %c0_16 = arith.constant 0 : index
    %32 = vector.load %arg2[%c0_14, %c0_15, %c0_16] : memref<12x32x16xf32, #tpu.memory_space<vmem>>, vector<1x32x16xf32>
    %33 = vector.shape_cast %32 : vector<1x32x16xf32> to vector<32x16xf32>
    %cst_17 = arith.constant dense<0.000000e+00> : vector<16x16xf32>
    %34 = tpu.matmul %28, %33, %cst_17 {dimension_numbers = #tpu.dot_dimension_numbers<[1], [0], [0], [1], [0, 0, 1, 1], [], []>} : vector<16x32xf32>, vector<32x16xf32>, vector<16x16xf32> -> vector<16x16xf32>
    %35 = vector.extract_strided_slice %30 {offsets = [0, 0], sizes = [1, 16], strides = [1, 1]} : vector<16x64xf32> to vector<1x16xf32>
    %36 = vector.broadcast %35 : vector<1x16xf32> to vector<16x16xf32>
    %37 = arith.addf %34, %36 : vector<16x16xf32>
    %c1 = arith.constant 1 : index
    %c0_18 = arith.constant 0 : index
    %c0_19 = arith.constant 0 : index
    %38 = vector.load %arg2[%c1, %c0_18, %c0_19] : memref<12x32x16xf32, #tpu.memory_space<vmem>>, vector<1x32x16xf32>
    %39 = vector.shape_cast %38 : vector<1x32x16xf32> to vector<32x16xf32>
    %cst_20 = arith.constant dense<0.000000e+00> : vector<16x16xf32>
    %40 = tpu.matmul %28, %39, %cst_20 {dimension_numbers = #tpu.dot_dimension_numbers<[1], [0], [0], [1], [0, 0, 1, 1], [], []>} : vector<16x32xf32>, vector<32x16xf32>, vector<16x16xf32> -> vector<16x16xf32>
    %41 = vector.extract_strided_slice %30 {offsets = [1, 0], sizes = [1, 16], strides = [1, 1]} : vector<16x64xf32> to vector<1x16xf32>
    %42 = vector.broadcast %41 : vector<1x16xf32> to vector<16x16xf32>
    %43 = arith.addf %40, %42 : vector<16x16xf32>
    %c2 = arith.constant 2 : index
    %c0_21 = arith.constant 0 : index
    %c0_22 = arith.constant 0 : index
    %44 = vector.load %arg2[%c2, %c0_21, %c0_22] : memref<12x32x16xf32, #tpu.memory_space<vmem>>, vector<1x32x16xf32>
    %45 = vector.shape_cast %44 : vector<1x32x16xf32> to vector<32x16xf32>
    %cst_23 = arith.constant dense<0.000000e+00> : vector<16x16xf32>
    %46 = tpu.matmul %28, %45, %cst_23 {dimension_numbers = #tpu.dot_dimension_numbers<[1], [0], [0], [1], [0, 0, 1, 1], [], []>} : vector<16x32xf32>, vector<32x16xf32>, vector<16x16xf32> -> vector<16x16xf32>
    %47 = vector.extract_strided_slice %30 {offsets = [2, 0], sizes = [1, 16], strides = [1, 1]} : vector<16x64xf32> to vector<1x16xf32>
    %48 = vector.broadcast %47 : vector<1x16xf32> to vector<16x16xf32>
    %49 = arith.addf %46, %48 : vector<16x16xf32>
    %cst_24 = arith.constant dense<0.000000e+00> : vector<16x16xf32>
    %50 = tpu.matmul %37, %43, %cst_24 {dimension_numbers = #tpu.dot_dimension_numbers<[1], [1], [0], [0], [0, 0, 1, 0], [], []>} : vector<16x16xf32>, vector<16x16xf32>, vector<16x16xf32> -> vector<16x16xf32>
    %cst_25 = arith.constant 2.500000e-01 : f32
    %51 = vector.broadcast %cst_25 : f32 to vector<16x16xf32>
    %52 = arith.mulf %50, %51 : vector<16x16xf32>
    %53 = arith.addf %52, %0 : vector<16x16xf32>
    %cst_26 = arith.constant dense<0xFF800000> : vector<16xf32>
    %54 = vector.multi_reduction <maximumf>, %53, %cst_26 [1] : vector<16x16xf32> to vector<16xf32>
    %55 = vector.shape_cast %54 : vector<16xf32> to vector<16x1xf32>
    %56 = vector.broadcast %55 : vector<16x1xf32> to vector<16x16xf32>
    %57 = arith.subf %53, %56 : vector<16x16xf32>
    %58 = math.exp %57 : vector<16x16xf32>
    %cst_27 = arith.constant dense<0.000000e+00> : vector<16xf32>
    %59 = vector.multi_reduction <add>, %58, %cst_27 [1] : vector<16x16xf32> to vector<16xf32>
    %60 = vector.shape_cast %59 : vector<16xf32> to vector<16x1xf32>
    %61 = vector.broadcast %60 : vector<16x1xf32> to vector<16x16xf32>
    %62 = arith.divf %58, %61 : vector<16x16xf32>
    %cst_28 = arith.constant dense<0.000000e+00> : vector<16x16xf32>
    %63 = tpu.matmul %62, %49, %cst_28 {dimension_numbers = #tpu.dot_dimension_numbers<[1], [0], [0], [1], [0, 0, 1, 1], [], []>} : vector<16x16xf32>, vector<16x16xf32>, vector<16x16xf32> -> vector<16x16xf32>
    %c0_29 = arith.constant 0 : index
    %c0_30 = arith.constant 0 : index
    %c0_31 = arith.constant 0 : index
    %64 = vector.load %arg3[%c0_29, %c0_30, %c0_31] : memref<4x16x32xf32, #tpu.memory_space<vmem>>, vector<1x16x32xf32>
    %65 = vector.shape_cast %64 : vector<1x16x32xf32> to vector<16x32xf32>
    %cst_32 = arith.constant dense<0.000000e+00> : vector<16x32xf32>
    %66 = tpu.matmul %63, %65, %cst_32 {dimension_numbers = #tpu.dot_dimension_numbers<[1], [0], [0], [1], [0, 0, 1, 1], [], []>} : vector<16x16xf32>, vector<16x32xf32>, vector<16x32xf32> -> vector<16x32xf32>
    %67 = vector.broadcast %31 : vector<1x32xf32> to vector<16x32xf32>
    %68 = arith.addf %67, %66 : vector<16x32xf32>
    %c3 = arith.constant 3 : index
    %c0_33 = arith.constant 0 : index
    %c0_34 = arith.constant 0 : index
    %69 = vector.load %arg2[%c3, %c0_33, %c0_34] : memref<12x32x16xf32, #tpu.memory_space<vmem>>, vector<1x32x16xf32>
    %70 = vector.shape_cast %69 : vector<1x32x16xf32> to vector<32x16xf32>
    %cst_35 = arith.constant dense<0.000000e+00> : vector<16x16xf32>
    %71 = tpu.matmul %28, %70, %cst_35 {dimension_numbers = #tpu.dot_dimension_numbers<[1], [0], [0], [1], [0, 0, 1, 1], [], []>} : vector<16x32xf32>, vector<32x16xf32>, vector<16x16xf32> -> vector<16x16xf32>
    %72 = vector.extract_strided_slice %30 {offsets = [3, 0], sizes = [1, 16], strides = [1, 1]} : vector<16x64xf32> to vector<1x16xf32>
    %73 = vector.broadcast %72 : vector<1x16xf32> to vector<16x16xf32>
    %74 = arith.addf %71, %73 : vector<16x16xf32>
    %c4 = arith.constant 4 : index
    %c0_36 = arith.constant 0 : index
    %c0_37 = arith.constant 0 : index
    %75 = vector.load %arg2[%c4, %c0_36, %c0_37] : memref<12x32x16xf32, #tpu.memory_space<vmem>>, vector<1x32x16xf32>
    %76 = vector.shape_cast %75 : vector<1x32x16xf32> to vector<32x16xf32>
    %cst_38 = arith.constant dense<0.000000e+00> : vector<16x16xf32>
    %77 = tpu.matmul %28, %76, %cst_38 {dimension_numbers = #tpu.dot_dimension_numbers<[1], [0], [0], [1], [0, 0, 1, 1], [], []>} : vector<16x32xf32>, vector<32x16xf32>, vector<16x16xf32> -> vector<16x16xf32>
    %78 = vector.extract_strided_slice %30 {offsets = [4, 0], sizes = [1, 16], strides = [1, 1]} : vector<16x64xf32> to vector<1x16xf32>
    %79 = vector.broadcast %78 : vector<1x16xf32> to vector<16x16xf32>
    %80 = arith.addf %77, %79 : vector<16x16xf32>
    %c5 = arith.constant 5 : index
    %c0_39 = arith.constant 0 : index
    %c0_40 = arith.constant 0 : index
    %81 = vector.load %arg2[%c5, %c0_39, %c0_40] : memref<12x32x16xf32, #tpu.memory_space<vmem>>, vector<1x32x16xf32>
    %82 = vector.shape_cast %81 : vector<1x32x16xf32> to vector<32x16xf32>
    %cst_41 = arith.constant dense<0.000000e+00> : vector<16x16xf32>
    %83 = tpu.matmul %28, %82, %cst_41 {dimension_numbers = #tpu.dot_dimension_numbers<[1], [0], [0], [1], [0, 0, 1, 1], [], []>} : vector<16x32xf32>, vector<32x16xf32>, vector<16x16xf32> -> vector<16x16xf32>
    %84 = vector.extract_strided_slice %30 {offsets = [5, 0], sizes = [1, 16], strides = [1, 1]} : vector<16x64xf32> to vector<1x16xf32>
    %85 = vector.broadcast %84 : vector<1x16xf32> to vector<16x16xf32>
    %86 = arith.addf %83, %85 : vector<16x16xf32>
    %cst_42 = arith.constant dense<0.000000e+00> : vector<16x16xf32>
    %87 = tpu.matmul %74, %80, %cst_42 {dimension_numbers = #tpu.dot_dimension_numbers<[1], [1], [0], [0], [0, 0, 1, 0], [], []>} : vector<16x16xf32>, vector<16x16xf32>, vector<16x16xf32> -> vector<16x16xf32>
    %cst_43 = arith.constant 2.500000e-01 : f32
    %88 = vector.broadcast %cst_43 : f32 to vector<16x16xf32>
    %89 = arith.mulf %87, %88 : vector<16x16xf32>
    %90 = arith.addf %89, %0 : vector<16x16xf32>
    %cst_44 = arith.constant dense<0xFF800000> : vector<16xf32>
    %91 = vector.multi_reduction <maximumf>, %90, %cst_44 [1] : vector<16x16xf32> to vector<16xf32>
    %92 = vector.shape_cast %91 : vector<16xf32> to vector<16x1xf32>
    %93 = vector.broadcast %92 : vector<16x1xf32> to vector<16x16xf32>
    %94 = arith.subf %90, %93 : vector<16x16xf32>
    %95 = math.exp %94 : vector<16x16xf32>
    %cst_45 = arith.constant dense<0.000000e+00> : vector<16xf32>
    %96 = vector.multi_reduction <add>, %95, %cst_45 [1] : vector<16x16xf32> to vector<16xf32>
    %97 = vector.shape_cast %96 : vector<16xf32> to vector<16x1xf32>
    %98 = vector.broadcast %97 : vector<16x1xf32> to vector<16x16xf32>
    %99 = arith.divf %95, %98 : vector<16x16xf32>
    %cst_46 = arith.constant dense<0.000000e+00> : vector<16x16xf32>
    %100 = tpu.matmul %99, %86, %cst_46 {dimension_numbers = #tpu.dot_dimension_numbers<[1], [0], [0], [1], [0, 0, 1, 1], [], []>} : vector<16x16xf32>, vector<16x16xf32>, vector<16x16xf32> -> vector<16x16xf32>
    %c1_47 = arith.constant 1 : index
    %c0_48 = arith.constant 0 : index
    %c0_49 = arith.constant 0 : index
    %101 = vector.load %arg3[%c1_47, %c0_48, %c0_49] : memref<4x16x32xf32, #tpu.memory_space<vmem>>, vector<1x16x32xf32>
    %102 = vector.shape_cast %101 : vector<1x16x32xf32> to vector<16x32xf32>
    %cst_50 = arith.constant dense<0.000000e+00> : vector<16x32xf32>
    %103 = tpu.matmul %100, %102, %cst_50 {dimension_numbers = #tpu.dot_dimension_numbers<[1], [0], [0], [1], [0, 0, 1, 1], [], []>} : vector<16x16xf32>, vector<16x32xf32>, vector<16x32xf32> -> vector<16x32xf32>
    %104 = arith.addf %68, %103 : vector<16x32xf32>
    %105 = arith.addf %104, %28 : vector<16x32xf32>
    %106 = vector.extract_strided_slice %30 {offsets = [9, 0], sizes = [1, 32], strides = [1, 1]} : vector<16x64xf32> to vector<1x32xf32>
    %107 = vector.extract_strided_slice %30 {offsets = [10, 0], sizes = [1, 32], strides = [1, 1]} : vector<16x64xf32> to vector<1x32xf32>
    %cst_51 = arith.constant dense<0.000000e+00> : vector<16xf32>
    %108 = vector.multi_reduction <add>, %105, %cst_51 [1] : vector<16x32xf32> to vector<16xf32>
    %109 = vector.shape_cast %108 : vector<16xf32> to vector<16x1xf32>
    %cst_52 = arith.constant 3.200000e+01 : f32
    %110 = vector.broadcast %cst_52 : f32 to vector<16x1xf32>
    %111 = arith.divf %109, %110 : vector<16x1xf32>
    %112 = vector.broadcast %111 : vector<16x1xf32> to vector<16x32xf32>
    %113 = arith.subf %105, %112 : vector<16x32xf32>
    %114 = arith.mulf %113, %113 : vector<16x32xf32>
    %cst_53 = arith.constant dense<0.000000e+00> : vector<16xf32>
    %115 = vector.multi_reduction <add>, %114, %cst_53 [1] : vector<16x32xf32> to vector<16xf32>
    %116 = vector.shape_cast %115 : vector<16xf32> to vector<16x1xf32>
    %cst_54 = arith.constant 3.200000e+01 : f32
    %117 = vector.broadcast %cst_54 : f32 to vector<16x1xf32>
    %118 = arith.divf %116, %117 : vector<16x1xf32>
    %119 = vector.broadcast %111 : vector<16x1xf32> to vector<16x32xf32>
    %120 = arith.subf %105, %119 : vector<16x32xf32>
    %cst_55 = arith.constant 9.99999996E-13 : f32
    %121 = vector.broadcast %cst_55 : f32 to vector<16x1xf32>
    %122 = arith.addf %118, %121 : vector<16x1xf32>
    %123 = math.rsqrt %122 : vector<16x1xf32>
    %124 = vector.broadcast %123 : vector<16x1xf32> to vector<16x32xf32>
    %125 = arith.mulf %120, %124 : vector<16x32xf32>
    %126 = vector.broadcast %106 : vector<1x32xf32> to vector<16x32xf32>
    %127 = arith.mulf %125, %126 : vector<16x32xf32>
    %128 = vector.broadcast %107 : vector<1x32xf32> to vector<16x32xf32>
    %129 = arith.addf %127, %128 : vector<16x32xf32>
    %c0_56 = arith.constant 0 : index
    %c0_57 = arith.constant 0 : index
    %c0_58 = arith.constant 0 : index
    %130 = vector.load %arg4[%c0_56, %c0_57, %c0_58] : memref<2x32x64xf32, #tpu.memory_space<vmem>>, vector<1x32x64xf32>
    %131 = vector.shape_cast %130 : vector<1x32x64xf32> to vector<32x64xf32>
    %cst_59 = arith.constant dense<0.000000e+00> : vector<16x64xf32>
    %132 = tpu.matmul %129, %131, %cst_59 {dimension_numbers = #tpu.dot_dimension_numbers<[1], [0], [0], [1], [0, 0, 1, 1], [], []>} : vector<16x32xf32>, vector<32x64xf32>, vector<16x64xf32> -> vector<16x64xf32>
    %133 = vector.extract_strided_slice %30 {offsets = [7, 0], sizes = [1, 64], strides = [1, 1]} : vector<16x64xf32> to vector<1x64xf32>
    %134 = vector.broadcast %133 : vector<1x64xf32> to vector<16x64xf32>
    %135 = arith.addf %132, %134 : vector<16x64xf32>
    %cst_60 = arith.constant 0.707106769 : f32
    %136 = vector.broadcast %cst_60 : f32 to vector<16x64xf32>
    %137 = arith.mulf %135, %136 : vector<16x64xf32>
    %138 = math.absf %137 : vector<16x64xf32>
    %cst_61 = arith.constant 0.327591091 : f32
    %139 = vector.broadcast %cst_61 : f32 to vector<16x64xf32>
    %140 = arith.mulf %139, %138 : vector<16x64xf32>
    %cst_62 = arith.constant 1.000000e+00 : f32
    %141 = vector.broadcast %cst_62 : f32 to vector<16x64xf32>
    %142 = arith.addf %141, %140 : vector<16x64xf32>
    %cst_63 = arith.constant 1.000000e+00 : f32
    %143 = vector.broadcast %cst_63 : f32 to vector<16x64xf32>
    %144 = arith.divf %143, %142 : vector<16x64xf32>
    %cst_64 = arith.constant 1.06140542 : f32
    %145 = vector.broadcast %cst_64 : f32 to vector<16x64xf32>
    %146 = arith.mulf %144, %145 : vector<16x64xf32>
    %cst_65 = arith.constant -1.45315206 : f32
    %147 = vector.broadcast %cst_65 : f32 to vector<16x64xf32>
    %148 = arith.addf %147, %146 : vector<16x64xf32>
    %149 = arith.mulf %144, %148 : vector<16x64xf32>
    %cst_66 = arith.constant 1.42141378 : f32
    %150 = vector.broadcast %cst_66 : f32 to vector<16x64xf32>
    %151 = arith.addf %150, %149 : vector<16x64xf32>
    %152 = arith.mulf %144, %151 : vector<16x64xf32>
    %cst_67 = arith.constant -0.284496725 : f32
    %153 = vector.broadcast %cst_67 : f32 to vector<16x64xf32>
    %154 = arith.addf %153, %152 : vector<16x64xf32>
    %155 = arith.mulf %144, %154 : vector<16x64xf32>
    %cst_68 = arith.constant 0.254829586 : f32
    %156 = vector.broadcast %cst_68 : f32 to vector<16x64xf32>
    %157 = arith.addf %156, %155 : vector<16x64xf32>
    %158 = arith.mulf %144, %157 : vector<16x64xf32>
    %cst_69 = arith.constant 0.000000e+00 : f32
    %159 = vector.broadcast %cst_69 : f32 to vector<16x64xf32>
    %160 = arith.subf %159, %138 : vector<16x64xf32>
    %161 = arith.mulf %160, %138 : vector<16x64xf32>
    %162 = math.exp %161 : vector<16x64xf32>
    %163 = arith.mulf %158, %162 : vector<16x64xf32>
    %cst_70 = arith.constant 1.000000e+00 : f32
    %164 = vector.broadcast %cst_70 : f32 to vector<16x64xf32>
    %165 = arith.subf %164, %163 : vector<16x64xf32>
    %cst_71 = arith.constant 0.000000e+00 : f32
    %166 = vector.broadcast %cst_71 : f32 to vector<16x64xf32>
    %167 = arith.cmpf olt, %137, %166 : vector<16x64xf32>
    %cst_72 = arith.constant 0.000000e+00 : f32
    %168 = vector.broadcast %cst_72 : f32 to vector<16x64xf32>
    %169 = arith.subf %168, %165 : vector<16x64xf32>
    %170 = arith.select %167, %169, %165 : vector<16x64xi1>, vector<16x64xf32>
    %cst_73 = arith.constant 5.000000e-01 : f32
    %171 = vector.broadcast %cst_73 : f32 to vector<16x64xf32>
    %172 = arith.mulf %171, %135 : vector<16x64xf32>
    %cst_74 = arith.constant 1.000000e+00 : f32
    %173 = vector.broadcast %cst_74 : f32 to vector<16x64xf32>
    %174 = arith.addf %173, %170 : vector<16x64xf32>
    %175 = arith.mulf %172, %174 : vector<16x64xf32>
    %c0_75 = arith.constant 0 : index
    %c0_76 = arith.constant 0 : index
    %c0_77 = arith.constant 0 : index
    %176 = vector.load %arg5[%c0_75, %c0_76, %c0_77] : memref<2x64x32xf32, #tpu.memory_space<vmem>>, vector<1x64x32xf32>
    %177 = vector.shape_cast %176 : vector<1x64x32xf32> to vector<64x32xf32>
    %cst_78 = arith.constant dense<0.000000e+00> : vector<16x32xf32>
    %178 = tpu.matmul %175, %177, %cst_78 {dimension_numbers = #tpu.dot_dimension_numbers<[1], [0], [0], [1], [0, 0, 1, 1], [], []>} : vector<16x64xf32>, vector<64x32xf32>, vector<16x32xf32> -> vector<16x32xf32>
    %179 = vector.extract_strided_slice %30 {offsets = [8, 0], sizes = [1, 32], strides = [1, 1]} : vector<16x64xf32> to vector<1x32xf32>
    %180 = vector.broadcast %179 : vector<1x32xf32> to vector<16x32xf32>
    %181 = arith.addf %178, %180 : vector<16x32xf32>
    %182 = arith.addf %181, %129 : vector<16x32xf32>
    %183 = vector.extract_strided_slice %30 {offsets = [11, 0], sizes = [1, 32], strides = [1, 1]} : vector<16x64xf32> to vector<1x32xf32>
    %184 = vector.extract_strided_slice %30 {offsets = [12, 0], sizes = [1, 32], strides = [1, 1]} : vector<16x64xf32> to vector<1x32xf32>
    %cst_79 = arith.constant dense<0.000000e+00> : vector<16xf32>
    %185 = vector.multi_reduction <add>, %182, %cst_79 [1] : vector<16x32xf32> to vector<16xf32>
    %186 = vector.shape_cast %185 : vector<16xf32> to vector<16x1xf32>
    %cst_80 = arith.constant 3.200000e+01 : f32
    %187 = vector.broadcast %cst_80 : f32 to vector<16x1xf32>
    %188 = arith.divf %186, %187 : vector<16x1xf32>
    %189 = vector.broadcast %188 : vector<16x1xf32> to vector<16x32xf32>
    %190 = arith.subf %182, %189 : vector<16x32xf32>
    %191 = arith.mulf %190, %190 : vector<16x32xf32>
    %cst_81 = arith.constant dense<0.000000e+00> : vector<16xf32>
    %192 = vector.multi_reduction <add>, %191, %cst_81 [1] : vector<16x32xf32> to vector<16xf32>
    %193 = vector.shape_cast %192 : vector<16xf32> to vector<16x1xf32>
    %cst_82 = arith.constant 3.200000e+01 : f32
    %194 = vector.broadcast %cst_82 : f32 to vector<16x1xf32>
    %195 = arith.divf %193, %194 : vector<16x1xf32>
    %196 = vector.broadcast %188 : vector<16x1xf32> to vector<16x32xf32>
    %197 = arith.subf %182, %196 : vector<16x32xf32>
    %cst_83 = arith.constant 9.99999996E-13 : f32
    %198 = vector.broadcast %cst_83 : f32 to vector<16x1xf32>
    %199 = arith.addf %195, %198 : vector<16x1xf32>
    %200 = math.rsqrt %199 : vector<16x1xf32>
    %201 = vector.broadcast %200 : vector<16x1xf32> to vector<16x32xf32>
    %202 = arith.mulf %197, %201 : vector<16x32xf32>
    %203 = vector.broadcast %183 : vector<1x32xf32> to vector<16x32xf32>
    %204 = arith.mulf %202, %203 : vector<16x32xf32>
    %205 = vector.broadcast %184 : vector<1x32xf32> to vector<16x32xf32>
    %206 = arith.addf %204, %205 : vector<16x32xf32>
    %c1_84 = arith.constant 1 : index
    %c0_85 = arith.constant 0 : index
    %c0_86 = arith.constant 0 : index
    %207 = vector.load %arg6[%c1_84, %c0_85, %c0_86] : memref<2x16x64xf32, #tpu.memory_space<vmem>>, vector<1x16x64xf32>
    %208 = vector.shape_cast %207 : vector<1x16x64xf32> to vector<16x64xf32>
    %209 = vector.extract_strided_slice %208 {offsets = [6, 0], sizes = [1, 32], strides = [1, 1]} : vector<16x64xf32> to vector<1x32xf32>
    %c6 = arith.constant 6 : index
    %c0_87 = arith.constant 0 : index
    %c0_88 = arith.constant 0 : index
    %210 = vector.load %arg2[%c6, %c0_87, %c0_88] : memref<12x32x16xf32, #tpu.memory_space<vmem>>, vector<1x32x16xf32>
    %211 = vector.shape_cast %210 : vector<1x32x16xf32> to vector<32x16xf32>
    %cst_89 = arith.constant dense<0.000000e+00> : vector<16x16xf32>
    %212 = tpu.matmul %206, %211, %cst_89 {dimension_numbers = #tpu.dot_dimension_numbers<[1], [0], [0], [1], [0, 0, 1, 1], [], []>} : vector<16x32xf32>, vector<32x16xf32>, vector<16x16xf32> -> vector<16x16xf32>
    %213 = vector.extract_strided_slice %208 {offsets = [0, 0], sizes = [1, 16], strides = [1, 1]} : vector<16x64xf32> to vector<1x16xf32>
    %214 = vector.broadcast %213 : vector<1x16xf32> to vector<16x16xf32>
    %215 = arith.addf %212, %214 : vector<16x16xf32>
    %c7 = arith.constant 7 : index
    %c0_90 = arith.constant 0 : index
    %c0_91 = arith.constant 0 : index
    %216 = vector.load %arg2[%c7, %c0_90, %c0_91] : memref<12x32x16xf32, #tpu.memory_space<vmem>>, vector<1x32x16xf32>
    %217 = vector.shape_cast %216 : vector<1x32x16xf32> to vector<32x16xf32>
    %cst_92 = arith.constant dense<0.000000e+00> : vector<16x16xf32>
    %218 = tpu.matmul %206, %217, %cst_92 {dimension_numbers = #tpu.dot_dimension_numbers<[1], [0], [0], [1], [0, 0, 1, 1], [], []>} : vector<16x32xf32>, vector<32x16xf32>, vector<16x16xf32> -> vector<16x16xf32>
    %219 = vector.extract_strided_slice %208 {offsets = [1, 0], sizes = [1, 16], strides = [1, 1]} : vector<16x64xf32> to vector<1x16xf32>
    %220 = vector.broadcast %219 : vector<1x16xf32> to vector<16x16xf32>
    %221 = arith.addf %218, %220 : vector<16x16xf32>
    %c8 = arith.constant 8 : index
    %c0_93 = arith.constant 0 : index
    %c0_94 = arith.constant 0 : index
    %222 = vector.load %arg2[%c8, %c0_93, %c0_94] : memref<12x32x16xf32, #tpu.memory_space<vmem>>, vector<1x32x16xf32>
    %223 = vector.shape_cast %222 : vector<1x32x16xf32> to vector<32x16xf32>
    %cst_95 = arith.constant dense<0.000000e+00> : vector<16x16xf32>
    %224 = tpu.matmul %206, %223, %cst_95 {dimension_numbers = #tpu.dot_dimension_numbers<[1], [0], [0], [1], [0, 0, 1, 1], [], []>} : vector<16x32xf32>, vector<32x16xf32>, vector<16x16xf32> -> vector<16x16xf32>
    %225 = vector.extract_strided_slice %208 {offsets = [2, 0], sizes = [1, 16], strides = [1, 1]} : vector<16x64xf32> to vector<1x16xf32>
    %226 = vector.broadcast %225 : vector<1x16xf32> to vector<16x16xf32>
    %227 = arith.addf %224, %226 : vector<16x16xf32>
    %cst_96 = arith.constant dense<0.000000e+00> : vector<16x16xf32>
    %228 = tpu.matmul %215, %221, %cst_96 {dimension_numbers = #tpu.dot_dimension_numbers<[1], [1], [0], [0], [0, 0, 1, 0], [], []>} : vector<16x16xf32>, vector<16x16xf32>, vector<16x16xf32> -> vector<16x16xf32>
    %cst_97 = arith.constant 2.500000e-01 : f32
    %229 = vector.broadcast %cst_97 : f32 to vector<16x16xf32>
    %230 = arith.mulf %228, %229 : vector<16x16xf32>
    %231 = arith.addf %230, %0 : vector<16x16xf32>
    %cst_98 = arith.constant dense<0xFF800000> : vector<16xf32>
    %232 = vector.multi_reduction <maximumf>, %231, %cst_98 [1] : vector<16x16xf32> to vector<16xf32>
    %233 = vector.shape_cast %232 : vector<16xf32> to vector<16x1xf32>
    %234 = vector.broadcast %233 : vector<16x1xf32> to vector<16x16xf32>
    %235 = arith.subf %231, %234 : vector<16x16xf32>
    %236 = math.exp %235 : vector<16x16xf32>
    %cst_99 = arith.constant dense<0.000000e+00> : vector<16xf32>
    %237 = vector.multi_reduction <add>, %236, %cst_99 [1] : vector<16x16xf32> to vector<16xf32>
    %238 = vector.shape_cast %237 : vector<16xf32> to vector<16x1xf32>
    %239 = vector.broadcast %238 : vector<16x1xf32> to vector<16x16xf32>
    %240 = arith.divf %236, %239 : vector<16x16xf32>
    %cst_100 = arith.constant dense<0.000000e+00> : vector<16x16xf32>
    %241 = tpu.matmul %240, %227, %cst_100 {dimension_numbers = #tpu.dot_dimension_numbers<[1], [0], [0], [1], [0, 0, 1, 1], [], []>} : vector<16x16xf32>, vector<16x16xf32>, vector<16x16xf32> -> vector<16x16xf32>
    %c2_101 = arith.constant 2 : index
    %c0_102 = arith.constant 0 : index
    %c0_103 = arith.constant 0 : index
    %242 = vector.load %arg3[%c2_101, %c0_102, %c0_103] : memref<4x16x32xf32, #tpu.memory_space<vmem>>, vector<1x16x32xf32>
    %243 = vector.shape_cast %242 : vector<1x16x32xf32> to vector<16x32xf32>
    %cst_104 = arith.constant dense<0.000000e+00> : vector<16x32xf32>
    %244 = tpu.matmul %241, %243, %cst_104 {dimension_numbers = #tpu.dot_dimension_numbers<[1], [0], [0], [1], [0, 0, 1, 1], [], []>} : vector<16x16xf32>, vector<16x32xf32>, vector<16x32xf32> -> vector<16x32xf32>
    %245 = vector.broadcast %209 : vector<1x32xf32> to vector<16x32xf32>
    %246 = arith.addf %245, %244 : vector<16x32xf32>
    %c9 = arith.constant 9 : index
    %c0_105 = arith.constant 0 : index
    %c0_106 = arith.constant 0 : index
    %247 = vector.load %arg2[%c9, %c0_105, %c0_106] : memref<12x32x16xf32, #tpu.memory_space<vmem>>, vector<1x32x16xf32>
    %248 = vector.shape_cast %247 : vector<1x32x16xf32> to vector<32x16xf32>
    %cst_107 = arith.constant dense<0.000000e+00> : vector<16x16xf32>
    %249 = tpu.matmul %206, %248, %cst_107 {dimension_numbers = #tpu.dot_dimension_numbers<[1], [0], [0], [1], [0, 0, 1, 1], [], []>} : vector<16x32xf32>, vector<32x16xf32>, vector<16x16xf32> -> vector<16x16xf32>
    %250 = vector.extract_strided_slice %208 {offsets = [3, 0], sizes = [1, 16], strides = [1, 1]} : vector<16x64xf32> to vector<1x16xf32>
    %251 = vector.broadcast %250 : vector<1x16xf32> to vector<16x16xf32>
    %252 = arith.addf %249, %251 : vector<16x16xf32>
    %c10 = arith.constant 10 : index
    %c0_108 = arith.constant 0 : index
    %c0_109 = arith.constant 0 : index
    %253 = vector.load %arg2[%c10, %c0_108, %c0_109] : memref<12x32x16xf32, #tpu.memory_space<vmem>>, vector<1x32x16xf32>
    %254 = vector.shape_cast %253 : vector<1x32x16xf32> to vector<32x16xf32>
    %cst_110 = arith.constant dense<0.000000e+00> : vector<16x16xf32>
    %255 = tpu.matmul %206, %254, %cst_110 {dimension_numbers = #tpu.dot_dimension_numbers<[1], [0], [0], [1], [0, 0, 1, 1], [], []>} : vector<16x32xf32>, vector<32x16xf32>, vector<16x16xf32> -> vector<16x16xf32>
    %256 = vector.extract_strided_slice %208 {offsets = [4, 0], sizes = [1, 16], strides = [1, 1]} : vector<16x64xf32> to vector<1x16xf32>
    %257 = vector.broadcast %256 : vector<1x16xf32> to vector<16x16xf32>
    %258 = arith.addf %255, %257 : vector<16x16xf32>
    %c11 = arith.constant 11 : index
    %c0_111 = arith.constant 0 : index
    %c0_112 = arith.constant 0 : index
    %259 = vector.load %arg2[%c11, %c0_111, %c0_112] : memref<12x32x16xf32, #tpu.memory_space<vmem>>, vector<1x32x16xf32>
    %260 = vector.shape_cast %259 : vector<1x32x16xf32> to vector<32x16xf32>
    %cst_113 = arith.constant dense<0.000000e+00> : vector<16x16xf32>
    %261 = tpu.matmul %206, %260, %cst_113 {dimension_numbers = #tpu.dot_dimension_numbers<[1], [0], [0], [1], [0, 0, 1, 1], [], []>} : vector<16x32xf32>, vector<32x16xf32>, vector<16x16xf32> -> vector<16x16xf32>
    %262 = vector.extract_strided_slice %208 {offsets = [5, 0], sizes = [1, 16], strides = [1, 1]} : vector<16x64xf32> to vector<1x16xf32>
    %263 = vector.broadcast %262 : vector<1x16xf32> to vector<16x16xf32>
    %264 = arith.addf %261, %263 : vector<16x16xf32>
    %cst_114 = arith.constant dense<0.000000e+00> : vector<16x16xf32>
    %265 = tpu.matmul %252, %258, %cst_114 {dimension_numbers = #tpu.dot_dimension_numbers<[1], [1], [0], [0], [0, 0, 1, 0], [], []>} : vector<16x16xf32>, vector<16x16xf32>, vector<16x16xf32> -> vector<16x16xf32>
    %cst_115 = arith.constant 2.500000e-01 : f32
    %266 = vector.broadcast %cst_115 : f32 to vector<16x16xf32>
    %267 = arith.mulf %265, %266 : vector<16x16xf32>
    %268 = arith.addf %267, %0 : vector<16x16xf32>
    %cst_116 = arith.constant dense<0xFF800000> : vector<16xf32>
    %269 = vector.multi_reduction <maximumf>, %268, %cst_116 [1] : vector<16x16xf32> to vector<16xf32>
    %270 = vector.shape_cast %269 : vector<16xf32> to vector<16x1xf32>
    %271 = vector.broadcast %270 : vector<16x1xf32> to vector<16x16xf32>
    %272 = arith.subf %268, %271 : vector<16x16xf32>
    %273 = math.exp %272 : vector<16x16xf32>
    %cst_117 = arith.constant dense<0.000000e+00> : vector<16xf32>
    %274 = vector.multi_reduction <add>, %273, %cst_117 [1] : vector<16x16xf32> to vector<16xf32>
    %275 = vector.shape_cast %274 : vector<16xf32> to vector<16x1xf32>
    %276 = vector.broadcast %275 : vector<16x1xf32> to vector<16x16xf32>
    %277 = arith.divf %273, %276 : vector<16x16xf32>
    %cst_118 = arith.constant dense<0.000000e+00> : vector<16x16xf32>
    %278 = tpu.matmul %277, %264, %cst_118 {dimension_numbers = #tpu.dot_dimension_numbers<[1], [0], [0], [1], [0, 0, 1, 1], [], []>} : vector<16x16xf32>, vector<16x16xf32>, vector<16x16xf32> -> vector<16x16xf32>
    %c3_119 = arith.constant 3 : index
    %c0_120 = arith.constant 0 : index
    %c0_121 = arith.constant 0 : index
    %279 = vector.load %arg3[%c3_119, %c0_120, %c0_121] : memref<4x16x32xf32, #tpu.memory_space<vmem>>, vector<1x16x32xf32>
    %280 = vector.shape_cast %279 : vector<1x16x32xf32> to vector<16x32xf32>
    %cst_122 = arith.constant dense<0.000000e+00> : vector<16x32xf32>
    %281 = tpu.matmul %278, %280, %cst_122 {dimension_numbers = #tpu.dot_dimension_numbers<[1], [0], [0], [1], [0, 0, 1, 1], [], []>} : vector<16x16xf32>, vector<16x32xf32>, vector<16x32xf32> -> vector<16x32xf32>
    %282 = arith.addf %246, %281 : vector<16x32xf32>
    %283 = arith.addf %282, %206 : vector<16x32xf32>
    %284 = vector.extract_strided_slice %208 {offsets = [9, 0], sizes = [1, 32], strides = [1, 1]} : vector<16x64xf32> to vector<1x32xf32>
    %285 = vector.extract_strided_slice %208 {offsets = [10, 0], sizes = [1, 32], strides = [1, 1]} : vector<16x64xf32> to vector<1x32xf32>
    %cst_123 = arith.constant dense<0.000000e+00> : vector<16xf32>
    %286 = vector.multi_reduction <add>, %283, %cst_123 [1] : vector<16x32xf32> to vector<16xf32>
    %287 = vector.shape_cast %286 : vector<16xf32> to vector<16x1xf32>
    %cst_124 = arith.constant 3.200000e+01 : f32
    %288 = vector.broadcast %cst_124 : f32 to vector<16x1xf32>
    %289 = arith.divf %287, %288 : vector<16x1xf32>
    %290 = vector.broadcast %289 : vector<16x1xf32> to vector<16x32xf32>
    %291 = arith.subf %283, %290 : vector<16x32xf32>
    %292 = arith.mulf %291, %291 : vector<16x32xf32>
    %cst_125 = arith.constant dense<0.000000e+00> : vector<16xf32>
    %293 = vector.multi_reduction <add>, %292, %cst_125 [1] : vector<16x32xf32> to vector<16xf32>
    %294 = vector.shape_cast %293 : vector<16xf32> to vector<16x1xf32>
    %cst_126 = arith.constant 3.200000e+01 : f32
    %295 = vector.broadcast %cst_126 : f32 to vector<16x1xf32>
    %296 = arith.divf %294, %295 : vector<16x1xf32>
    %297 = vector.broadcast %289 : vector<16x1xf32> to vector<16x32xf32>
    %298 = arith.subf %283, %297 : vector<16x32xf32>
    %cst_127 = arith.constant 9.99999996E-13 : f32
    %299 = vector.broadcast %cst_127 : f32 to vector<16x1xf32>
    %300 = arith.addf %296, %299 : vector<16x1xf32>
    %301 = math.rsqrt %300 : vector<16x1xf32>
    %302 = vector.broadcast %301 : vector<16x1xf32> to vector<16x32xf32>
    %303 = arith.mulf %298, %302 : vector<16x32xf32>
    %304 = vector.broadcast %284 : vector<1x32xf32> to vector<16x32xf32>
    %305 = arith.mulf %303, %304 : vector<16x32xf32>
    %306 = vector.broadcast %285 : vector<1x32xf32> to vector<16x32xf32>
    %307 = arith.addf %305, %306 : vector<16x32xf32>
    %c1_128 = arith.constant 1 : index
    %c0_129 = arith.constant 0 : index
    %c0_130 = arith.constant 0 : index
    %308 = vector.load %arg4[%c1_128, %c0_129, %c0_130] : memref<2x32x64xf32, #tpu.memory_space<vmem>>, vector<1x32x64xf32>
    %309 = vector.shape_cast %308 : vector<1x32x64xf32> to vector<32x64xf32>
    %cst_131 = arith.constant dense<0.000000e+00> : vector<16x64xf32>
    %310 = tpu.matmul %307, %309, %cst_131 {dimension_numbers = #tpu.dot_dimension_numbers<[1], [0], [0], [1], [0, 0, 1, 1], [], []>} : vector<16x32xf32>, vector<32x64xf32>, vector<16x64xf32> -> vector<16x64xf32>
    %311 = vector.extract_strided_slice %208 {offsets = [7, 0], sizes = [1, 64], strides = [1, 1]} : vector<16x64xf32> to vector<1x64xf32>
    %312 = vector.broadcast %311 : vector<1x64xf32> to vector<16x64xf32>
    %313 = arith.addf %310, %312 : vector<16x64xf32>
    %cst_132 = arith.constant 0.707106769 : f32
    %314 = vector.broadcast %cst_132 : f32 to vector<16x64xf32>
    %315 = arith.mulf %313, %314 : vector<16x64xf32>
    %316 = math.absf %315 : vector<16x64xf32>
    %cst_133 = arith.constant 0.327591091 : f32
    %317 = vector.broadcast %cst_133 : f32 to vector<16x64xf32>
    %318 = arith.mulf %317, %316 : vector<16x64xf32>
    %cst_134 = arith.constant 1.000000e+00 : f32
    %319 = vector.broadcast %cst_134 : f32 to vector<16x64xf32>
    %320 = arith.addf %319, %318 : vector<16x64xf32>
    %cst_135 = arith.constant 1.000000e+00 : f32
    %321 = vector.broadcast %cst_135 : f32 to vector<16x64xf32>
    %322 = arith.divf %321, %320 : vector<16x64xf32>
    %cst_136 = arith.constant 1.06140542 : f32
    %323 = vector.broadcast %cst_136 : f32 to vector<16x64xf32>
    %324 = arith.mulf %322, %323 : vector<16x64xf32>
    %cst_137 = arith.constant -1.45315206 : f32
    %325 = vector.broadcast %cst_137 : f32 to vector<16x64xf32>
    %326 = arith.addf %325, %324 : vector<16x64xf32>
    %327 = arith.mulf %322, %326 : vector<16x64xf32>
    %cst_138 = arith.constant 1.42141378 : f32
    %328 = vector.broadcast %cst_138 : f32 to vector<16x64xf32>
    %329 = arith.addf %328, %327 : vector<16x64xf32>
    %330 = arith.mulf %322, %329 : vector<16x64xf32>
    %cst_139 = arith.constant -0.284496725 : f32
    %331 = vector.broadcast %cst_139 : f32 to vector<16x64xf32>
    %332 = arith.addf %331, %330 : vector<16x64xf32>
    %333 = arith.mulf %322, %332 : vector<16x64xf32>
    %cst_140 = arith.constant 0.254829586 : f32
    %334 = vector.broadcast %cst_140 : f32 to vector<16x64xf32>
    %335 = arith.addf %334, %333 : vector<16x64xf32>
    %336 = arith.mulf %322, %335 : vector<16x64xf32>
    %cst_141 = arith.constant 0.000000e+00 : f32
    %337 = vector.broadcast %cst_141 : f32 to vector<16x64xf32>
    %338 = arith.subf %337, %316 : vector<16x64xf32>
    %339 = arith.mulf %338, %316 : vector<16x64xf32>
    %340 = math.exp %339 : vector<16x64xf32>
    %341 = arith.mulf %336, %340 : vector<16x64xf32>
    %cst_142 = arith.constant 1.000000e+00 : f32
    %342 = vector.broadcast %cst_142 : f32 to vector<16x64xf32>
    %343 = arith.subf %342, %341 : vector<16x64xf32>
    %cst_143 = arith.constant 0.000000e+00 : f32
    %344 = vector.broadcast %cst_143 : f32 to vector<16x64xf32>
    %345 = arith.cmpf olt, %315, %344 : vector<16x64xf32>
    %cst_144 = arith.constant 0.000000e+00 : f32
    %346 = vector.broadcast %cst_144 : f32 to vector<16x64xf32>
    %347 = arith.subf %346, %343 : vector<16x64xf32>
    %348 = arith.select %345, %347, %343 : vector<16x64xi1>, vector<16x64xf32>
    %cst_145 = arith.constant 5.000000e-01 : f32
    %349 = vector.broadcast %cst_145 : f32 to vector<16x64xf32>
    %350 = arith.mulf %349, %313 : vector<16x64xf32>
    %cst_146 = arith.constant 1.000000e+00 : f32
    %351 = vector.broadcast %cst_146 : f32 to vector<16x64xf32>
    %352 = arith.addf %351, %348 : vector<16x64xf32>
    %353 = arith.mulf %350, %352 : vector<16x64xf32>
    %c1_147 = arith.constant 1 : index
    %c0_148 = arith.constant 0 : index
    %c0_149 = arith.constant 0 : index
    %354 = vector.load %arg5[%c1_147, %c0_148, %c0_149] : memref<2x64x32xf32, #tpu.memory_space<vmem>>, vector<1x64x32xf32>
    %355 = vector.shape_cast %354 : vector<1x64x32xf32> to vector<64x32xf32>
    %cst_150 = arith.constant dense<0.000000e+00> : vector<16x32xf32>
    %356 = tpu.matmul %353, %355, %cst_150 {dimension_numbers = #tpu.dot_dimension_numbers<[1], [0], [0], [1], [0, 0, 1, 1], [], []>} : vector<16x64xf32>, vector<64x32xf32>, vector<16x32xf32> -> vector<16x32xf32>
    %357 = vector.extract_strided_slice %208 {offsets = [8, 0], sizes = [1, 32], strides = [1, 1]} : vector<16x64xf32> to vector<1x32xf32>
    %358 = vector.broadcast %357 : vector<1x32xf32> to vector<16x32xf32>
    %359 = arith.addf %356, %358 : vector<16x32xf32>
    %360 = arith.addf %359, %307 : vector<16x32xf32>
    %361 = vector.extract_strided_slice %208 {offsets = [11, 0], sizes = [1, 32], strides = [1, 1]} : vector<16x64xf32> to vector<1x32xf32>
    %362 = vector.extract_strided_slice %208 {offsets = [12, 0], sizes = [1, 32], strides = [1, 1]} : vector<16x64xf32> to vector<1x32xf32>
    %cst_151 = arith.constant dense<0.000000e+00> : vector<16xf32>
    %363 = vector.multi_reduction <add>, %360, %cst_151 [1] : vector<16x32xf32> to vector<16xf32>
    %364 = vector.shape_cast %363 : vector<16xf32> to vector<16x1xf32>
    %cst_152 = arith.constant 3.200000e+01 : f32
    %365 = vector.broadcast %cst_152 : f32 to vector<16x1xf32>
    %366 = arith.divf %364, %365 : vector<16x1xf32>
    %367 = vector.broadcast %366 : vector<16x1xf32> to vector<16x32xf32>
    %368 = arith.subf %360, %367 : vector<16x32xf32>
    %369 = arith.mulf %368, %368 : vector<16x32xf32>
    %cst_153 = arith.constant dense<0.000000e+00> : vector<16xf32>
    %370 = vector.multi_reduction <add>, %369, %cst_153 [1] : vector<16x32xf32> to vector<16xf32>
    %371 = vector.shape_cast %370 : vector<16xf32> to vector<16x1xf32>
    %cst_154 = arith.constant 3.200000e+01 : f32
    %372 = vector.broadcast %cst_154 : f32 to vector<16x1xf32>
    %373 = arith.divf %371, %372 : vector<16x1xf32>
    %374 = vector.broadcast %366 : vector<16x1xf32> to vector<16x32xf32>
    %375 = arith.subf %360, %374 : vector<16x32xf32>
    %cst_155 = arith.constant 9.99999996E-13 : f32
    %376 = vector.broadcast %cst_155 : f32 to vector<16x1xf32>
    %377 = arith.addf %373, %376 : vector<16x1xf32>
    %378 = math.rsqrt %377 : vector<16x1xf32>
    %379 = vector.broadcast %378 : vector<16x1xf32> to vector<16x32xf32>
    %380 = arith.mulf %375, %379 : vector<16x32xf32>
    %381 = vector.broadcast %361 : vector<1x32xf32> to vector<16x32xf32>
    %382 = arith.mulf %380, %381 : vector<16x32xf32>
    %383 = vector.broadcast %362 : vector<1x32xf32> to vector<16x32xf32>
    %384 = arith.addf %382, %383 : vector<16x32xf32>
    %cst_156 = arith.constant dense<0.000000e+00> : vector<2x32xf32>
    %385 = tpu.matmul %1, %384, %cst_156 {dimension_numbers = #tpu.dot_dimension_numbers<[1], [0], [0], [1], [0, 0, 1, 1], [], []>} : vector<2x16xf32>, vector<16x32xf32>, vector<2x32xf32> -> vector<2x32xf32>
    %cst_157 = arith.constant dense<0.000000e+00> : vector<2xf32>
    %386 = vector.multi_reduction <add>, %1, %cst_157 [1] : vector<2x16xf32> to vector<2xf32>
    %387 = vector.shape_cast %386 : vector<2xf32> to vector<2x1xf32>
    %cst_158 = arith.constant 1.000000e+00 : f32
    %388 = vector.broadcast %cst_158 : f32 to vector<2x1xf32>
    %389 = arith.maximumf %387, %388 : vector<2x1xf32>
    %390 = vector.broadcast %389 : vector<2x1xf32> to vector<2x32xf32>
    %391 = arith.divf %385, %390 : vector<2x32xf32>
    %c0_159 = arith.constant 0 : index
    %c0_160 = arith.constant 0 : index
    %392 = vector.load %arg7[%c0_159, %c0_160] : memref<2x32xf32, #tpu.memory_space<vmem>>, vector<2x32xf32>
    tpu.vector_store %arg7[%c0_159, %c0_160], %391 {strides = array<i32>} : memref<2x32xf32, #tpu.memory_space<vmem>>, vector<2x32xf32>,
    return
  }
}

</mosaic_0001>

<bundles_post_ra>
// kernel: gte_embedder_forward.1
= control target key start
LH: loop header
LB: loop body
LE: loop exit
PB: predicated region body
PF: predicated region fallthrough
CT: control target
= control target key end

     0   :  { %vm34_vm0 = vcmask 261120   ;;  %s4426_s0 = inlined_call_operand.vmem [shape: f32[16,32], index: 0, kind: input, shape index: {}]   ;;  %s4427_s1 = inlined_call_operand.vmem [shape: f32[18,16], index: 1, kind: input, shape index: {}]   ;;  %s4428_s2 = inlined_call_operand.vmem [shape: f32[12,32,16], index: 2, kind: input, shape index: {}]   ;;  %s4429_s3 = inlined_call_operand.vmem [shape: f32[4,16,32], index: 3, kind: input, shape index: {}]   ;;  %s4430_s4 = inlined_call_operand.vmem [shape: f32[2,32,64], index: 4, kind: input, shape index: {}]   ;;  %s4431_s5 = inlined_call_operand.vmem [shape: f32[2,64,32], index: 5, kind: input, shape index: {}]   ;;  %s4432_s6 = inlined_call_operand.vmem [shape: f32[2,16,64], index: 6, kind: input, shape index: {}]   ;;  %s4433_s7 = inlined_call_operand.hbm [shape: f32[2,32], index: 7, kind: output, shape index: {}]  }
   0x1   :  { %v32_v0 = vld [vmem:[%s4426_s0] sm:$0xff]  ;;  %v33_v1 = vld [vmem:[%s4426_s0 + $0x8] sm:$0xff] }
   0x2   :  { %12 = vsyncpa [#allocation3], 0  ;;  %v35_v2 = vsel %vm34_vm0, %v32_v0, 0.0  ;;  %v38_v3 = vsel %vm34_vm0, %v33_v1, 0.0  ;;  %v74_v14 = vld [vmem:[%s4428_s2] sm:$0xff]  ;;  %v75_v15 = vld [vmem:[%s4428_s2 + $0x8] sm:$0xff]  ;;  %v62_v31 = vlaneseq }
   0x3   :  { %36 = vadd.xlane.f32.xlu0 %v35_v2  ;;  %v3522_v16 = vpack.c.bf16 %v75_v15, %v74_v14  ;;  %v2957_v17 = vld [vmem:[%s4428_s2 + $0x20] sm:$0xff]  ;;  %v2958_v18 = vld [vmem:[%s4428_s2 + $0x28] sm:$0xff]  ;;  %v76_v20 = vld [vmem:[%s4428_s2 + $0x10] sm:$0xff]  ;;  %vm331_vm1 = vcmask 130048   ;;  %vm1342_vm5 = vcmask 523264   ;;  %vm3832_vm8 = vmmov 0  }
   0x4   :  { %v3530_v19 = vpack.c.bf16 %v2958_v18, %v2957_v17  ;;  %v77_v21 = vld [vmem:[%s4428_s2 + $0x18] sm:$0xff]  ;;  %v2959_v23 = vld [vmem:[%s4428_s2 + $0x30] sm:$0xff]  ;;  %v2963_v26 = vld [vmem:[%s4428_s2 + $0x40] sm:$0xff]  ;;  %v3915_v35 = vshrl.u32 %v62_v31, 7  ;;  %vm2932_vm9 = vcmask 123904   ;;  %vm2939_vm10 = vcmask 254976  }
   0x5   :  { %3523 = vmatprep.subr.bf16.mxu0 %v3522_v16  ;;  %v3526_v22 = vpack.c.bf16 %v77_v21, %v76_v20  ;;  %v2960_v24 = vld [vmem:[%s4428_s2 + $0x38] sm:$0xff]  ;;  %v2964_v27 = vld [vmem:[%s4428_s2 + $0x48] sm:$0xff]  ;;  %v2965_v48 = vld [vmem:[%s4428_s2 + $0x50] sm:$0xff] }
   0x6   :  { %3525 = vmatpush3.bf16.msra.mxu0 %v3522_v16  ;;  %3531 = vmatprep.subr.bf16.mxu1 %v3530_v19  ;;  %v3534_v25 = vpack.c.bf16 %v2960_v24, %v2959_v23  ;;  %v3538_v28 = vpack.c.bf16 %v2964_v27, %v2963_v26  ;;  %v3918_v37 = vsub.s32 5, %v3915_v35  ;;  %v3923_v38 = vld [vmem:[%s4432_s6 + $0x8] sm:$0xff]  ;;  %v3926_v39 = vsub.s32 6, %v3915_v35  ;;  %v2966_v49 = vld [vmem:[%s4428_s2 + $0x58] sm:$0xff]  ;;  %v3960_v54 = vld [vmem:[%s4432_s6] sm:$0xff] }
   0x7   :  { %39 = vadd.xlane.f32.xlu0 %v38_v3  ;;  %3533 = vmatpush3.bf16.msra.mxu1 %v3530_v19  ;;  %v3542_v52 = vpack.c.bf16 %v2966_v49, %v2965_v48  ;;  %v3955_v53 = vsub.s32 1, %v3915_v35  ;;  %v3963_v55 = vsub.s32 0, %v3915_v35  ;;  %v3970_v63 = vsub.s32 2, %v3915_v35  ;;  %vm3974_vm2 = vmpackc.low %vm331_vm1, %vm331_vm1  ;;  %v3994_v15 = vld [vmem:[%s4427_s1] sm:$0xff] }
   0x8   :  { %3527 = vmatprep.subr.bf16.mxu0 %v3526_v22  ;;  %3535 = vmatprep.subr.bf16.mxu1 %v3534_v25  ;;  %v65_v40 = vrot.slane %v3923_v38, %v3918_v37  ;;  %v71_v43 = vrot.slane %v3923_v38, %v3926_v39  ;;  %v2977_v31 = vld [vmem:[%s4428_s2 + $0x60] sm:$0xff] }
   0x9   :  { %v171_v56 = vrot.slane %v3960_v54, %v3955_v53  ;;  %v81_v57 = vrot.slane %v3960_v54, %v3963_v55 }
   0xa   :  { %3529 = vmatpush3.bf16.msra.mxu0 %v3526_v22 }
   0xb   :  { %3537 = vmatpush3.bf16.msra.mxu1 %v3534_v25  ;;  %3539 = vmatprep.subr.bf16.mxu0 %v3538_v28 }
  0x90   :  { %v37_v4 = vpop.xlane.xlu0 %36 }
  0x91   :  { %v42_v5 = vmul.f32 0.03125, %v37_v4  ;;  %v255_v4 = vrot.slane %v3960_v54, %v3970_v63 }
  0x93   :  { %v44_v6 = vsub.f32 %v32_v0, %v42_v5 }
  0x94   :  { %v40_v7 = vpop.xlane.xlu0 %39 }
  0x95   :  { %v43_v8 = vmul.f32 0.03125, %v40_v7  ;;  %v46_v9 = vmul.f32 %v44_v6, %v44_v6 }
  0x97   :  { %v45_v10 = vsub.f32 %v33_v1, %v43_v8  ;;  %v48_v11 = vsel %vm34_vm0, %v46_v9, 0.0 }
  0x98   :  { %49 = vadd.xlane.f32.xlu1 %v48_v11 }
  0x99   :  { %v47_v12 = vmul.f32 %v45_v10, %v45_v10 }
  0x9b   :  { %v51_v13 = vsel %vm34_vm0, %v47_v12, 0.0  ;;  %v3989_v12 = vld [vmem:[%s4427_s1 + $0x8] sm:$0xff] }
  0x9c   :  { %52 = vadd.xlane.f32.xlu1 %v51_v13 }
 0x125   :  { %v50_v29 = vpop.xlane.xlu1 %49 }
 0x126   :  { %v54_v30 = vmul.f32 0.03125, %v50_v29 }
 0x128   :  { %v56_v32 = vadd.f32 1e-12, %v54_v30 }
 0x129   :  { %v53_v33 = vpop.xlane.xlu1 %52 }
 0x12a   :  { %3737 = vrsqrt.f32 %v56_v32  ;;  %v55_v34 = vmul.f32 0.03125, %v53_v33  ;;  %v2978_v32 = vld [vmem:[%s4428_s2 + $0x68] sm:$0xff] }
 0x12b   :  { %v3560_v33 = vpack.c.bf16 %v2978_v32, %v2977_v31 }
 0x12c   :  { %v57_v36 = vadd.f32 1e-12, %v55_v34  ;;  %v526_v34 = vld [vmem:[%s4429_s3] sm:$0xff] }
 0x12e   :  { %3739 = vrsqrt.f32 %v57_v36  ;;  %v527_v36 = vld [vmem:[%s4429_s3 + $0x8] sm:$0xff] }
 0x134   :  { %v3738_v41 = vpop.eup %3737 }
 0x135   :  { %v60_v42 = vmul.f32 %v3738_v41, %v44_v6 }
 0x137   :  { %v66_v44 = vmul.f32 %v65_v40, %v60_v42 }
 0x138   :  { %v3740_v45 = vpop.eup %3739 }
 0x139   :  { %v3932_v46 = vadd.f32 %v71_v43, %v66_v44  ;;  %v61_v47 = vmul.f32 %v3740_v45, %v45_v10  ;;  %v2979_v44 = vld [vmem:[%s4428_s2 + $0x70] sm:$0xff]  ;;  %v2980_v45 = vld [vmem:[%s4428_s2 + $0x78] sm:$0xff] }
 0x13b   :  { %v67_v50 = vmul.f32 %v65_v40, %v61_v47  ;;  %3247 = vmatprep.mubr.msk.f32.mxu0 %vm34_vm0, %v3932_v46  ;;  %3258 = vmatprep.mubr.msk.f32.mxu1 %vm34_vm0, %v3932_v46  ;;  %v3556_v40 = vpack.c.bf16 %v527_v36, %v526_v34 }
 0x13d   :  { %v3944_v51 = vadd.f32 %v71_v43, %v67_v50  ;;  %v3564_v50 = vpack.c.bf16 %v2980_v45, %v2979_v44 }
 0x13f   :  { %3248 = vmatmul.mubr.msk.f32.vlgmr.msra.gmra.mrb[0].mxu0 %vm34_vm0, %v3944_v51  ;;  %3259 = vmatmul.mubr.msk.f32.vlgmr.msra.gmra.mrb[0].mxu1 %vm34_vm0, %v3944_v51 }
 0x140   :  { %3541 = vmatpush3.bf16.msra.mxu0 %v3538_v28  ;;  %3269 = vmatprep.mubr.msk.f32.mxu0 %vm34_vm0, %v3932_v46 }
 0x141   :  { %3543 = vmatprep.subr.bf16.mxu0 %v3542_v52 }
 0x144   :  { %3545 = vmatpush3.bf16.msra.mxu0 %v3542_v52  ;;  %v2989_v52 = vld [vmem:[%s4428_s2 + $0xa0] sm:$0xff] }
 0x147   :  { %3270 = vmatmul.mubr.msk.f32.vlgmr.msra.gmra.mrb[2].mxu0 %vm34_vm0, %v3944_v51 }
 0x212   :  { %v3249_v58 = vpop.f32.mrb[0].mxu0  ;;  %v3260_v59 = vpop.f32.mrb[0].mxu1 }
 0x213   :  { %v244_v60 = vadd.f32 %v3260_v59, %v171_v56  ;;  %v154_v61 = vpop.f32.mrb[1].mxu0  ;;  %v238_v62 = vpop.f32.mrb[1].mxu1  ;;  %v160_v9 = vadd.f32 %v3249_v58, %v81_v57  ;;  %v2991_v58 = vld [vmem:[%s4428_s2 + $0xb0] sm:$0xff]  ;;  %v2992_v59 = vld [vmem:[%s4428_s2 + $0xb8] sm:$0xff] }
 0x214   :  { %v155_v0 = vadd.f32 %v154_v61, %v81_v57  ;;  %v239_v1 = vadd.f32 %v238_v62, %v171_v56  ;;  %v2990_v56 = vld [vmem:[%s4428_s2 + $0xa8] sm:$0xff]  ;;  %v2983_v61 = vld [vmem:[%s4428_s2 + $0x80] sm:$0xff] }
 0x215   :  { %v3576_v57 = vpack.c.bf16 %v2990_v56, %v2989_v52  ;;  %v2984_v62 = vld [vmem:[%s4428_s2 + $0x88] sm:$0xff]  ;;  %v3001_v52 = vld [vmem:[%s4429_s3 + $0x10] sm:$0xff]  ;;  %v3002_v56 = vld [vmem:[%s4429_s3 + $0x18] sm:$0xff] }
 0x216   :  { %v3546_v3 = vpack.c.bf16 %v244_v60, %v239_v1  ;;  %3276 = vmatprep.mubr.msk.f32.mxu1 %vm331_vm1, %v155_v0  ;;  %v3580_v60 = vpack.c.bf16 %v2992_v59, %v2991_v58  ;;  %v3568_v0 = vpack.c.bf16 %v2984_v62, %v2983_v61  ;;  %v2985_v1 = vld [vmem:[%s4428_s2 + $0x90] sm:$0xff] }
 0x218   :  { %3548 = vmatprep.subr.msk.bf16.mxu1 %vm3974_vm2, %v3546_v3 }
 0x219   :  { %3551 = vmatpush3.bf16.xpose.msk.msra.mxu1 %vm3974_vm2, %v3546_v3  ;;  %v2986_v3 = vld [vmem:[%s4428_s2 + $0x98] sm:$0xff] }
 0x21a   :  { %v3271_v5 = vpop.f32.mrb[2].mxu0  ;;  %3557 = vmatprep.subr.bf16.mxu1 %v3556_v40 }
 0x21b   :  { %v328_v6 = vadd.f32 %v3271_v5, %v255_v4  ;;  %v322_v7 = vpop.f32.mrb[3].mxu0 }
 0x21c   :  { %v323_v8 = vadd.f32 %v322_v7, %v255_v4  ;;  %v4055_v7 = vsub.s32 3, %v3915_v35 }
 0x21e   :  { %v3552_v10 = vpack.c.bf16 %v328_v6, %v323_v8  ;;  %v3572_v6 = vpack.c.bf16 %v2986_v3, %v2985_v1  ;;  %v623_v8 = vrot.slane %v3960_v54, %v4055_v7 }
 0x220   :  { %3553 = vmatprep.subr.bf16.mxu0 %v3552_v10  ;;  %3277 = vmatmul.mubr.msk.f32.vlgmr.msra.gmra.mrb[2].mxu1 %vm331_vm1, %v160_v9 }
 0x221   :  { %3555 = vmatpush3.bf16.msra.mxu0 %v3552_v10  ;;  %3559 = vmatpush3.bf16.msra.mxu1 %v3556_v40 }
 0x222   :  { %3561 = vmatprep.subr.bf16.mxu0 %v3560_v33  ;;  %3569 = vmatprep.subr.bf16.mxu1 %v3568_v0 }
 0x2f3   :  { %v3278_v11 = vpop.f32.mrb[2].mxu1 }
 0x2f4   :  { %v420_v13 = vmul.f32 0.25, %v3278_v11  ;;  %v410_v14 = vpop.f32.mrb[3].mxu1 }
 0x2f5   :  { %v419_v16 = vmul.f32 0.25, %v410_v14  ;;  %v791_v14 = vrot.slane %v3960_v54, %v3918_v37 }
 0x2f6   :  { %v422_v17 = vadd.f32 %v420_v13, %v3989_v12 }
 0x2f7   :  { %v421_v18 = vadd.f32 %v419_v16, %v3994_v15 }
 0x2f8   :  { %v426_v19 = vsel %vm331_vm1, %v422_v17, -inf }
 0x2f9   :  { %427 = vmax.xlane.f32.xlu1 %v426_v19  ;;  %v423_v20 = vsel %vm331_vm1, %v421_v18, -inf }
 0x2fa   :  { %424 = vmax.xlane.f32.xlu0 %v423_v20 }
 0x386   :  { %v428_v21 = vpop.xlane.xlu1 %427 }
 0x387   :  { %v430_v22 = vsub.f32 %v422_v17, %v428_v21  ;;  %v425_v23 = vpop.xlane.xlu0 %424  ;;  %v4069_v21 = vsub.s32 4, %v3915_v35 }
 0x388   :  { %v429_v24 = vsub.f32 %v421_v18, %v425_v23 }
 0x389   :  { %v433_v25 = vmul.f32 1.442695, %v430_v22  ;;  %v707_v22 = vrot.slane %v3960_v54, %v4069_v21 }
 0x38a   :  { %v431_v26 = vmul.f32 1.442695, %v429_v24 }
 0x38b   :  { %3741 = vpow2.f32 %v433_v25 }
 0x38c   :  { %3743 = vpow2.f32 %v431_v26 }
 0x395   :  { %v3742_v27 = vpop.eup %3741 }
 0x396   :  { %v3744_v28 = vpop.eup %3743  ;;  %v438_v29 = vsel %vm331_vm1, %v3742_v27, 0.0 }
 0x397   :  { %439 = vadd.xlane.f32.xlu1 %v438_v29  ;;  %v435_v30 = vsel %vm331_vm1, %v3744_v28, 0.0 }
 0x398   :  { %436 = vadd.xlane.f32.xlu0 %v435_v30 }
 0x424   :  { %v440_v41 = vpop.xlane.xlu1 %439 }
 0x425   :  { %3745 = vrcp.f32 %v440_v41  ;;  %v437_v42 = vpop.xlane.xlu0 %436 }
 0x426   :  { %3747 = vrcp.f32 %v437_v42 }
 0x42f   :  { %v3746_v43 = vpop.eup %3745 }
 0x430   :  { %v3748_v47 = vpop.eup %3747  ;;  %v444_v49 = vmul.f32 %v3746_v43, %v3742_v27 }
 0x431   :  { %v442_v48 = vmul.f32 %v3748_v47, %v3744_v28 }
 0x433   :  { %3283 = vmatprep.mubr.msk.f32.mxu0 %vm331_vm1, %v442_v48 }
 0x434   :  { %3284 = vmatmul.mubr.msk.f32.vlgmr.msra.gmra.mrb[4].mxu0 %vm331_vm1, %v444_v49 }
 0x435   :  { %3563 = vmatpush3.bf16.msra.mxu0 %v3560_v33  ;;  %3301 = vmatprep.mubr.msk.f32.mxu0 %vm34_vm0, %v3932_v46 }
 0x436   :  { %3565 = vmatprep.subr.bf16.mxu0 %v3564_v50 }
 0x439   :  { %3567 = vmatpush3.bf16.msra.mxu0 %v3564_v50 }
 0x43a   :  { %3577 = vmatprep.subr.bf16.mxu0 %v3576_v57 }
 0x43c   :  { %3302 = vmatmul.mubr.msk.f32.vlgmr.msra.gmra.mrb[6].mxu0 %vm34_vm0, %v3944_v51 }
 0x43d   :  { %3579 = vmatpush3.bf16.msra.mxu0 %v3576_v57  ;;  %3323 = vmatprep.mubr.msk.f32.mxu0 %vm34_vm0, %v3932_v46  ;;  %v3594_v57 = vpack.c.bf16 %v3002_v56, %v3001_v52  ;;  %v1330_v56 = vld [vmem:[%s4431_s5] sm:$0xff] }
 0x43e   :  { %3581 = vmatprep.subr.bf16.mxu0 %v3580_v60 }
 0x441   :  { %3583 = vmatpush3.bf16.msra.mxu0 %v3580_v60 }
 0x444   :  { %3324 = vmatmul.mubr.msk.f32.vlgmr.msra.gmra.mrb[8].mxu0 %vm34_vm0, %v3944_v51 }
 0x507   :  { %v3285_v4 = vpop.f32.mrb[4].mxu0 }
 0x508   :  { %v517_v5 = vpop.f32.mrb[5].mxu0 }
 0x509   :  { %3290 = vmatprep.mubr.msk.f32.mxu1 %vm331_vm1, %v517_v5 }
 0x50a   :  { %3291 = vmatmul.mubr.msk.f32.vlgmr.msra.gmra.mrb[4].mxu1 %vm331_vm1, %v3285_v4  ;;  %v612_v4 = vrot.slane %v3960_v54, %v3926_v39 }
 0x50b   :  { %3571 = vmatpush3.bf16.msra.mxu1 %v3568_v0  ;;  %3312 = vmatprep.mubr.msk.f32.mxu1 %vm34_vm0, %v3932_v46 }
 0x50c   :  { %3573 = vmatprep.subr.bf16.mxu1 %v3572_v6 }
 0x50f   :  { %v3303_v9 = vpop.f32.mrb[6].mxu0  ;;  %3575 = vmatpush3.bf16.msra.mxu1 %v3572_v6 }
 0x510   :  { %v696_v10 = vadd.f32 %v3303_v9, %v623_v8  ;;  %v690_v11 = vpop.f32.mrb[7].mxu0 }
 0x511   :  { %v691_v13 = vadd.f32 %v690_v11, %v623_v8 }
 0x512   :  { %3313 = vmatmul.mubr.msk.f32.vlgmr.msra.gmra.mrb[6].mxu1 %vm34_vm0, %v3944_v51 }
 0x513   :  { %3330 = vmatprep.mubr.msk.f32.mxu1 %vm331_vm1, %v691_v13 }
 0x517   :  { %v3325_v16 = vpop.f32.mrb[8].mxu0 }
 0x518   :  { %v864_v17 = vadd.f32 %v3325_v16, %v791_v14  ;;  %v858_v18 = vpop.f32.mrb[9].mxu0 }
 0x519   :  { %v859_v19 = vadd.f32 %v858_v18, %v791_v14 }
 0x51b   :  { %v3590_v20 = vpack.c.bf16 %v864_v17, %v859_v19 }
 0x51d   :  { %3591 = vmatprep.subr.bf16.mxu0 %v3590_v20 }
 0x51e   :  { %3593 = vmatpush3.bf16.msra.mxu0 %v3590_v20 }
 0x5e5   :  { %v3314_v23 = vpop.f32.mrb[6].mxu1 }
 0x5e6   :  { %v780_v24 = vadd.f32 %v3314_v23, %v707_v22  ;;  %v774_v25 = vpop.f32.mrb[7].mxu1 }
 0x5e7   :  { %v775_v26 = vadd.f32 %v774_v25, %v707_v22 }
 0x5e9   :  { %v3584_v27 = vpack.c.bf16 %v780_v24, %v775_v26  ;;  %v1188_v26 = vld [vmem:[%s4430_s4 + $0x8] sm:$0xff] }
 0x5eb   :  { %3586 = vmatprep.subr.msk.bf16.mxu1 %vm3974_vm2, %v3584_v27 }
 0x5ec   :  { %3589 = vmatpush3.bf16.xpose.msk.msra.mxu1 %vm3974_vm2, %v3584_v27 }
 0x5ed   :  { %3595 = vmatprep.subr.bf16.mxu1 %v3594_v57 }
 0x5f3   :  { %3331 = vmatmul.mubr.msk.f32.vlgmr.msra.gmra.mrb[8].mxu1 %vm331_vm1, %v696_v10 }
 0x5f4   :  { %3597 = vmatpush3.bf16.msra.mxu1 %v3594_v57  ;;  %v1331_v57 = vld [vmem:[%s4431_s5 + $0x8] sm:$0xff] }
 0x6c6   :  { %v3332_v28 = vpop.f32.mrb[8].mxu1 }
 0x6c7   :  { %v955_v29 = vmul.f32 0.25, %v3332_v28  ;;  %v945_v30 = vpop.f32.mrb[9].mxu1  ;;  %v1189_v28 = vld [vmem:[%s4430_s4 + $0x10] sm:$0xff] }
 0x6c8   :  { %v954_v31 = vmul.f32 0.25, %v945_v30 }
 0x6c9   :  { %v957_v32 = vadd.f32 %v955_v29, %v3989_v12  ;;  %v1190_v29 = vld [vmem:[%s4430_s4 + $0x18] sm:$0xff] }
 0x6ca   :  { %v956_v33 = vadd.f32 %v954_v31, %v3994_v15  ;;  %v3602_v30 = vpack.c.bf16 %v1190_v29, %v1189_v28 }
 0x6cb   :  { %v961_v34 = vsel %vm331_vm1, %v957_v32, -inf }
 0x6cc   :  { %962 = vmax.xlane.f32.xlu1 %v961_v34  ;;  %v958_v36 = vsel %vm331_vm1, %v956_v33, -inf }
 0x6cd   :  { %959 = vmax.xlane.f32.xlu0 %v958_v36 }
 0x759   :  { %v963_v40 = vpop.xlane.xlu1 %962 }
 0x75a   :  { %v965_v41 = vsub.f32 %v957_v32, %v963_v40  ;;  %v960_v42 = vpop.xlane.xlu0 %959 }
 0x75b   :  { %v964_v43 = vsub.f32 %v956_v33, %v960_v42 }
 0x75c   :  { %v968_v44 = vmul.f32 1.442695, %v965_v41  ;;  %v1178_v41 = vrot.slane %v3923_v38, %v3955_v53 }
 0x75d   :  { %v966_v45 = vmul.f32 1.442695, %v964_v43 }
 0x75e   :  { %3749 = vpow2.f32 %v968_v44 }
 0x75f   :  { %3751 = vpow2.f32 %v966_v45 }
 0x768   :  { %v3750_v47 = vpop.eup %3749 }
 0x769   :  { %v3752_v48 = vpop.eup %3751  ;;  %v973_v49 = vsel %vm331_vm1, %v3750_v47, 0.0 }
 0x76a   :  { %974 = vadd.xlane.f32.xlu1 %v973_v49  ;;  %v970_v50 = vsel %vm331_vm1, %v3752_v48, 0.0 }
 0x76b   :  { %971 = vadd.xlane.f32.xlu0 %v970_v50 }
 0x7f7   :  { %v975_v58 = vpop.xlane.xlu1 %974 }
 0x7f8   :  { %3753 = vrcp.f32 %v975_v58  ;;  %v972_v59 = vpop.xlane.xlu0 %971  ;;  %v3606_v58 = vpack.c.bf16 %v1331_v57, %v1330_v56 }
 0x7f9   :  { %3755 = vrcp.f32 %v972_v59  ;;  %v1332_v59 = vld [vmem:[%s4431_s5 + $0x10] sm:$0xff] }
 0x7fa   :  { %3607 = vmatprep.subr.bf16.mxu1 %v3606_v58 }
 0x802   :  { %v3754_v60 = vpop.eup %3753 }
 0x803   :  { %v3756_v61 = vpop.eup %3755  ;;  %v979_v0 = vmul.f32 %v3754_v60, %v3750_v47  ;;  %v1184_v47 = vrot.slane %v3923_v38, %v3970_v63  ;;  %v1333_v60 = vld [vmem:[%s4431_s5 + $0x18] sm:$0xff] }
 0x804   :  { %v977_v62 = vmul.f32 %v3756_v61, %v3752_v48  ;;  %v3610_v61 = vpack.c.bf16 %v1333_v60, %v1332_v59 }
 0x806   :  { %3337 = vmatprep.mubr.msk.f32.mxu0 %vm331_vm1, %v977_v62  ;;  %v1334_v62 = vld [vmem:[%s4431_s5 + $0x20] sm:$0xff] }
 0x807   :  { %3338 = vmatmul.mubr.msk.f32.vlgmr.msra.gmra.mrb[10].mxu0 %vm331_vm1, %v979_v0  ;;  %v1335_v0 = vld [vmem:[%s4431_s5 + $0x28] sm:$0xff] }
 0x8da   :  { %v3339_v1 = vpop.f32.mrb[10].mxu0 }
 0x8db   :  { %v1052_v3 = vpop.f32.mrb[11].mxu0 }
 0x8dc   :  { %3344 = vmatprep.mubr.msk.f32.mxu1 %vm331_vm1, %v1052_v3  ;;  %v1336_v3 = vld [vmem:[%s4431_s5 + $0x30] sm:$0xff] }
 0x8dd   :  { %3345 = vmatmul.mubr.msk.f32.vlgmr.msra.gmra.mrb[4].mxu1 %vm331_vm1, %v3339_v1  ;;  %v3614_v1 = vpack.c.bf16 %v1335_v0, %v1334_v62 }
 0x8de   :  { %3609 = vmatpush3.bf16.msra.mxu1 %v3606_v58 }
 0x8df   :  { %3611 = vmatprep.subr.bf16.mxu1 %v3610_v61 }
 0x8e2   :  { %3613 = vmatpush3.bf16.msra.mxu1 %v3610_v61 }
 0x8e3   :  { %3615 = vmatprep.subr.bf16.mxu1 %v3614_v1 }
 0x8e6   :  { %3617 = vmatpush3.bf16.msra.mxu1 %v3614_v1 }
 0x9b0   :  { %v3346_v5 = vpop.f32.mrb[4].mxu1 }
 0x9b1   :  { %v3725_v6 = vadd.f32 %v3346_v5, %v612_v4  ;;  %v1136_v8 = vpop.f32.mrb[5].mxu1 }
 0x9b2   :  { %v3726_v9 = vadd.f32 %v1136_v8, %v612_v4  ;;  %v1337_v4 = vld [vmem:[%s4431_s5 + $0x38] sm:$0xff] }
 0x9b3   :  { %v1148_v10 = vadd.f32 %v3725_v6, %v3944_v51  ;;  %v3618_v5 = vpack.c.bf16 %v1337_v4, %v1336_v3  ;;  %v1193_v6 = vsub.s32 7, %v3915_v35 }
 0x9b4   :  { %v1147_v11 = vadd.f32 %v3726_v9, %v3932_v46  ;;  %v1187_v46 = vld [vmem:[%s4430_s4] sm:$0xff] }
 0x9b5   :  { %v1152_v13 = vsel %vm34_vm0, %v1148_v10, 0.0  ;;  %v3598_v27 = vpack.c.bf16 %v1188_v26, %v1187_v46  ;;  %3619 = vmatprep.subr.bf16.mxu1 %v3618_v5  ;;  %v1194_v8 = vrot.slane %v3960_v54, %v1193_v6 }
 0x9b6   :  { %1153 = vadd.xlane.f32.xlu1 %v1152_v13  ;;  %v1149_v14 = vsel %vm34_vm0, %v1147_v11, 0.0  ;;  %3621 = vmatpush3.bf16.msra.mxu1 %v3618_v5 }
 0x9b7   :  { %1150 = vadd.xlane.f32.xlu0 %v1149_v14  ;;  %3599 = vmatprep.subr.bf16.mxu0 %v3598_v27 }
 0x9b8   :  { %3601 = vmatpush3.bf16.msra.mxu0 %v3598_v27 }
 0x9b9   :  { %3603 = vmatprep.subr.bf16.mxu0 %v3602_v30 }
 0x9bc   :  { %3605 = vmatpush3.bf16.msra.mxu0 %v3602_v30 }
 0xa43   :  { %v1154_v16 = vpop.xlane.xlu1 %1153 }
 0xa44   :  { %v1156_v17 = vmul.f32 0.03125, %v1154_v16  ;;  %v1151_v18 = vpop.xlane.xlu0 %1150 }
 0xa45   :  { %v1155_v19 = vmul.f32 0.03125, %v1151_v18 }
 0xa46   :  { %v1158_v20 = vsub.f32 %v1148_v10, %v1156_v17 }
 0xa47   :  { %v1157_v22 = vsub.f32 %v1147_v11, %v1155_v19 }
 0xa48   :  { %v1160_v23 = vmul.f32 %v1158_v20, %v1158_v20 }
 0xa49   :  { %v1159_v24 = vmul.f32 %v1157_v22, %v1157_v22 }
 0xa4a   :  { %v1164_v25 = vsel %vm34_vm0, %v1160_v23, 0.0 }
 0xa4b   :  { %1165 = vadd.xlane.f32.xlu1 %v1164_v25  ;;  %v1161_v51 = vsel %vm34_vm0, %v1159_v24, 0.0 }
 0xa4c   :  { %1162 = vadd.xlane.f32.xlu0 %v1161_v51 }
 0xad8   :  { %v1166_v31 = vpop.xlane.xlu1 %1165 }
 0xad9   :  { %v1168_v32 = vmul.f32 0.03125, %v1166_v31  ;;  %v1163_v33 = vpop.xlane.xlu0 %1162 }
 0xada   :  { %v1167_v34 = vmul.f32 0.03125, %v1163_v33 }
 0xadb   :  { %v1170_v36 = vadd.f32 1e-12, %v1168_v32 }
 0xadc   :  { %v1169_v40 = vadd.f32 1e-12, %v1167_v34 }
 0xadd   :  { %3757 = vrsqrt.f32 %v1170_v36 }
 0xade   :  { %3759 = vrsqrt.f32 %v1169_v40 }
 0xae7   :  { %v3758_v42 = vpop.eup %3757 }
 0xae8   :  { %v3760_v43 = vpop.eup %3759  ;;  %v1174_v44 = vmul.f32 %v3758_v42, %v1158_v20 }
 0xae9   :  { %v1173_v45 = vmul.f32 %v3760_v43, %v1157_v22 }
 0xaea   :  { %v1180_v48 = vmul.f32 %v1178_v41, %v1174_v44 }
 0xaeb   :  { %v1179_v49 = vmul.f32 %v1178_v41, %v1173_v45 }
 0xaec   :  { %v4120_v52 = vadd.f32 %v1184_v47, %v1180_v48 }
 0xaed   :  { %v4118_v50 = vadd.f32 %v1184_v47, %v1179_v49 }
 0xaef   :  { %3355 = vmatprep.mubr.msk.f32.mxu0 %vm34_vm0, %v4118_v50 }
 0xaf0   :  { %3356 = vmatmul.mubr.msk.f32.vlgmr.msra.gmra.mrb[12].mxu0 %vm34_vm0, %v4120_v52 }
 0xbc3   :  { %v3357_v9 = vpop.f32.mrb[12].mxu0 }
 0xbc4   :  { %v1273_v10 = vadd.f32 %v3357_v9, %v1194_v8  ;;  %v1267_v11 = vpop.f32.mrb[13].mxu0 }
 0xbc5   :  { %v1268_v13 = vadd.f32 %v1267_v11, %v1194_v8 }
 0xbc6   :  { %v1277_v14 = vmul.f32 0.70710677, %v1273_v10 }
 0xbc7   :  { %v1276_v16 = vmul.f32 0.70710677, %v1268_v13  ;;  %v1324_v9 = vmul.f32 0.5, %v1268_v13 }
 0xbc8   :  { %v1279_v17 = vand.u32 2147483647, %v1277_v14  ;;  %vm1319_vm3 = vcmp.lt.f32.partialorder %v1277_v14, 0.0 }
 0xbc9   :  { %v1278_v18 = vand.u32 2147483647, %v1276_v16  ;;  %vm1318_vm4 = vcmp.lt.f32.partialorder %v1276_v16, 0.0 }
 0xbca   :  { %v1281_v19 = vmul.f32 0.3275911, %v1279_v17  ;;  %v1307_v24 = vsub.f32 0.0, %v1279_v17 }
 0xbcb   :  { %v1280_v20 = vmul.f32 0.3275911, %v1278_v18  ;;  %v1306_v25 = vsub.f32 0.0, %v1278_v18 }
 0xbcc   :  { %v1283_v22 = vadd.f32 1.0, %v1281_v19  ;;  %v1309_v46 = vmul.f32 %v1307_v24, %v1279_v17  ;;  %v1325_v17 = vmul.f32 0.5, %v1273_v10 }
 0xbcd   :  { %v1282_v23 = vadd.f32 1.0, %v1280_v20  ;;  %v1308_v27 = vmul.f32 %v1306_v25, %v1278_v18  ;;  %v1341_v20 = vrot.slane %v3923_v38, %v3963_v55 }
 0xbce   :  { %3761 = vrcp.f32 %v1283_v22  ;;  %v1312_v30 = vmul.f32 1.442695, %v1309_v46 }
 0xbcf   :  { %3763 = vrcp.f32 %v1282_v23  ;;  %v1310_v33 = vmul.f32 1.442695, %v1308_v27 }
 0xbd0   :  { %3765 = vpow2.f32 %v1312_v30 }
 0xbd1   :  { %3767 = vpow2.f32 %v1310_v33 }
 0xbd8   :  { %v3762_v51 = vpop.eup %3761 }
 0xbd9   :  { %v3764_v26 = vpop.eup %3763  ;;  %v1289_v54 = vmul.f32 1.0614054, %v3762_v51 }
 0xbda   :  { %v1288_v28 = vmul.f32 1.0614054, %v3764_v26  ;;  %v3766_v57 = vpop.eup %3765 }
 0xbdb   :  { %v1291_v29 = vadd.f32 -1.4531521, %v1289_v54  ;;  %v3768_v59 = vpop.eup %3767 }
 0xbdc   :  { %v1290_v31 = vadd.f32 -1.4531521, %v1288_v28 }
 0xbdd   :  { %v1293_v32 = vmul.f32 %v3762_v51, %v1291_v29 }
 0xbde   :  { %v1292_v34 = vmul.f32 %v3764_v26, %v1290_v31 }
 0xbdf   :  { %v1295_v36 = vadd.f32 1.4214138, %v1293_v32  ;;  %v3012_v32 = vld [vmem:[%s4428_s2 + $0xc8] sm:$0xff] }
 0xbe0   :  { %v1294_v40 = vadd.f32 1.4214138, %v1292_v34  ;;  %v3023_v34 = vld [vmem:[%s4428_s2 + $0x100] sm:$0xff] }
 0xbe1   :  { %v1297_v41 = vmul.f32 %v3762_v51, %v1295_v36  ;;  %v3024_v36 = vld [vmem:[%s4428_s2 + $0x108] sm:$0xff] }
 0xbe2   :  { %v1296_v42 = vmul.f32 %v3764_v26, %v1294_v40  ;;  %v3638_v40 = vpack.c.bf16 %v3024_v36, %v3023_v34  ;;  %v3042_v34 = vld [vmem:[%s4428_s2 + $0x138] sm:$0xff] }
 0xbe3   :  { %v1299_v43 = vadd.f32 -0.28449672, %v1297_v41  ;;  %v3013_v41 = vld [vmem:[%s4428_s2 + $0xd0] sm:$0xff] }
 0xbe4   :  { %v1298_v44 = vadd.f32 -0.28449672, %v1296_v42  ;;  %3639 = vmatprep.subr.bf16.mxu1 %v3638_v40  ;;  %v3014_v42 = vld [vmem:[%s4428_s2 + $0xd8] sm:$0xff] }
 0xbe5   :  { %v1301_v45 = vmul.f32 %v3762_v51, %v1299_v43  ;;  %v3626_v43 = vpack.c.bf16 %v3014_v42, %v3013_v41  ;;  %v3051_v41 = vld [vmem:[%s4428_s2 + $0x160] sm:$0xff]  ;;  %v3052_v42 = vld [vmem:[%s4428_s2 + $0x168] sm:$0xff] }
 0xbe6   :  { %v1300_v47 = vmul.f32 %v3764_v26, %v1298_v44  ;;  %v3025_v44 = vld [vmem:[%s4428_s2 + $0x110] sm:$0xff] }
 0xbe7   :  { %v1303_v48 = vadd.f32 0.2548296, %v1301_v45  ;;  %v3026_v45 = vld [vmem:[%s4428_s2 + $0x118] sm:$0xff] }
 0xbe8   :  { %v1302_v49 = vadd.f32 0.2548296, %v1300_v47  ;;  %v3642_v47 = vpack.c.bf16 %v3026_v45, %v3025_v44  ;;  %v3053_v44 = vld [vmem:[%s4428_s2 + $0x170] sm:$0xff]  ;;  %v3054_v45 = vld [vmem:[%s4428_s2 + $0x178] sm:$0xff] }
 0xbe9   :  { %v1305_v56 = vmul.f32 %v3762_v51, %v1303_v48  ;;  %v3017_v48 = vld [vmem:[%s4428_s2 + $0xe0] sm:$0xff] }
 0xbea   :  { %v1304_v58 = vmul.f32 %v3764_v26, %v1302_v49  ;;  %v3018_v49 = vld [vmem:[%s4428_s2 + $0xe8] sm:$0xff] }
 0xbeb   :  { %v1315_v60 = vmul.f32 %v3766_v57, %v1305_v56  ;;  %v3630_v56 = vpack.c.bf16 %v3018_v49, %v3017_v48 }
 0xbec   :  { %v1314_v61 = vmul.f32 %v3768_v59, %v1304_v58 }
 0xbed   :  { %v1317_v62 = vsub.f32 1.0, %v1315_v60 }
 0xbee   :  { %v1316_v0 = vsub.f32 1.0, %v1314_v61 }
 0xbef   :  { %v1321_v1 = vsub.f32 0.0, %v1317_v62 }
 0xbf0   :  { %v1320_v3 = vsub.f32 0.0, %v1316_v0 }
 0xbf1   :  { %v1323_v4 = vsel %vm1319_vm3, %v1321_v1, %v1317_v62 }
 0xbf2   :  { %v1327_v5 = vadd.f32 1.0, %v1323_v4  ;;  %v1322_v8 = vsel %vm1318_vm4, %v1320_v3, %v1316_v0  ;;  %v1455_v0 = vrot.slane %v3923_v38, %v4055_v7 }
 0xbf3   :  { %v1326_v11 = vadd.f32 1.0, %v1322_v8 }
 0xbf4   :  { %v1329_v19 = vmul.f32 %v1327_v5, %v1325_v17  ;;  %v1461_v5 = vrot.slane %v3923_v38, %v4069_v21  ;;  %v3019_v17 = vld [vmem:[%s4428_s2 + $0xf0] sm:$0xff] }
 0xbf5   :  { %v1328_v18 = vmul.f32 %v1326_v11, %v1324_v9  ;;  %v4223_v38 = vld [vmem:[%s4432_s6 + $0x10] sm:$0xff] }
 0xbf7   :  { %3374 = vmatprep.mubr.msk.f32.mxu1 %vm1342_vm5, %v1328_v18  ;;  %v3020_v18 = vld [vmem:[%s4428_s2 + $0xf8] sm:$0xff] }
 0xbf8   :  { %3375 = vmatmul.mubr.msk.f32.vlgmr.msra.gmra.mrb[10].mxu1 %vm1342_vm5, %v1329_v19 }
 0xbf9   :  { %3641 = vmatpush3.bf16.msra.mxu1 %v3638_v40 }
 0xbfa   :  { %3643 = vmatprep.subr.bf16.mxu1 %v3642_v47 }
 0xbfd   :  { %3645 = vmatpush3.bf16.msra.mxu1 %v3642_v47  ;;  %v3680_v47 = vpack.c.bf16 %v3054_v45, %v3053_v44 }
 0xccb   :  { %v3376_v22 = vpop.f32.mrb[10].mxu1 }
 0xccc   :  { %v1421_v14 = vadd.f32 %v3376_v22, %v1341_v20  ;;  %v1415_v23 = vpop.f32.mrb[11].mxu1  ;;  %v3634_v22 = vpack.c.bf16 %v3020_v18, %v3019_v17 }
 0xccd   :  { %v1416_v24 = vadd.f32 %v1415_v23, %v1341_v20  ;;  %v1475_v23 = vrot.slane %v4223_v38, %v3963_v55 }
 0xcce   :  { %v1425_v16 = vadd.f32 %v1421_v14, %v4120_v52  ;;  %v1649_v14 = vrot.slane %v4223_v38, %v3970_v63 }
 0xccf   :  { %v1424_v13 = vadd.f32 %v1416_v24, %v4118_v50  ;;  %v3011_v50 = vld [vmem:[%s4428_s2 + $0xc0] sm:$0xff] }
 0xcd0   :  { %v1429_v10 = vsel %vm34_vm0, %v1425_v16, 0.0  ;;  %v3622_v33 = vpack.c.bf16 %v3012_v32, %v3011_v50 }
 0xcd1   :  { %1430 = vadd.xlane.f32.xlu1 %v1429_v10  ;;  %v1426_v25 = vsel %vm34_vm0, %v1424_v13, 0.0 }
 0xcd2   :  { %1427 = vadd.xlane.f32.xlu0 %v1426_v25  ;;  %3623 = vmatprep.subr.bf16.mxu0 %v3622_v33 }
 0xcd3   :  { %3625 = vmatpush3.bf16.msra.mxu0 %v3622_v33  ;;  %v3041_v33 = vld [vmem:[%s4428_s2 + $0x130] sm:$0xff] }
 0xcd4   :  { %3627 = vmatprep.subr.bf16.mxu0 %v3626_v43  ;;  %v3664_v40 = vpack.c.bf16 %v3042_v34, %v3041_v33  ;;  %v3047_v33 = vld [vmem:[%s4428_s2 + $0x150] sm:$0xff]  ;;  %v3048_v34 = vld [vmem:[%s4428_s2 + $0x158] sm:$0xff] }
 0xcd7   :  { %3629 = vmatpush3.bf16.msra.mxu0 %v3626_v43  ;;  %v3676_v43 = vpack.c.bf16 %v3052_v42, %v3051_v41  ;;  %v3672_v41 = vpack.c.bf16 %v3048_v34, %v3047_v33 }
 0xcd8   :  { %3631 = vmatprep.subr.bf16.mxu0 %v3630_v56 }
 0xd5e   :  { %v1431_v51 = vpop.xlane.xlu1 %1430 }
 0xd5f   :  { %v1433_v46 = vmul.f32 0.03125, %v1431_v51  ;;  %v1428_v26 = vpop.xlane.xlu0 %1427 }
 0xd60   :  { %v1432_v54 = vmul.f32 0.03125, %v1428_v26 }
 0xd61   :  { %v1435_v27 = vsub.f32 %v1425_v16, %v1433_v46 }
 0xd62   :  { %v1434_v28 = vsub.f32 %v1424_v13, %v1432_v54  ;;  %v1565_v54 = vrot.slane %v4223_v38, %v3955_v53 }
 0xd63   :  { %v1437_v29 = vmul.f32 %v1435_v27, %v1435_v27 }
 0xd64   :  { %v1436_v30 = vmul.f32 %v1434_v28, %v1434_v28 }
 0xd65   :  { %v1441_v31 = vsel %vm34_vm0, %v1437_v29, 0.0 }
 0xd66   :  { %1442 = vadd.xlane.f32.xlu1 %v1441_v31  ;;  %v1438_v52 = vsel %vm34_vm0, %v1436_v30, 0.0  ;;  %v3039_v30 = vld [vmem:[%s4428_s2 + $0x120] sm:$0xff]  ;;  %v3040_v31 = vld [vmem:[%s4428_s2 + $0x128] sm:$0xff] }
 0xd67   :  { %1439 = vadd.xlane.f32.xlu0 %v1438_v52  ;;  %v3660_v32 = vpack.c.bf16 %v3040_v31, %v3039_v30 }
 0xdf3   :  { %v1443_v57 = vpop.xlane.xlu1 %1442 }
 0xdf4   :  { %v1445_v58 = vmul.f32 0.03125, %v1443_v57  ;;  %v1440_v59 = vpop.xlane.xlu0 %1439 }
 0xdf5   :  { %v1444_v60 = vmul.f32 0.03125, %v1440_v59 }
 0xdf6   :  { %v1447_v61 = vadd.f32 1e-12, %v1445_v58 }
 0xdf7   :  { %v1446_v62 = vadd.f32 1e-12, %v1444_v60 }
 0xdf8   :  { %3769 = vrsqrt.f32 %v1447_v61  ;;  %v2017_v61 = vrot.slane %v4223_v38, %v4055_v7 }
 0xdf9   :  { %3771 = vrsqrt.f32 %v1446_v62 }
 0xe02   :  { %v3770_v1 = vpop.eup %3769 }
 0xe03   :  { %v3772_v3 = vpop.eup %3771  ;;  %v1451_v4 = vmul.f32 %v3770_v1, %v1435_v27 }
 0xe04   :  { %v1450_v8 = vmul.f32 %v3772_v3, %v1434_v28 }
 0xe05   :  { %v1457_v9 = vmul.f32 %v1455_v0, %v1451_v4  ;;  %v2185_v4 = vrot.slane %v4223_v38, %v3918_v37 }
 0xe06   :  { %v1456_v11 = vmul.f32 %v1455_v0, %v1450_v8 }
 0xe07   :  { %v4206_v20 = vadd.f32 %v1461_v5, %v1457_v9 }
 0xe08   :  { %v4204_v19 = vadd.f32 %v1461_v5, %v1456_v11 }
 0xe0a   :  { %3385 = vmatprep.mubr.msk.f32.mxu0 %vm34_vm0, %v4204_v19  ;;  %3407 = vmatprep.mubr.msk.f32.mxu1 %vm34_vm0, %v4204_v19 }
 0xe0b   :  { %3386 = vmatmul.mubr.msk.f32.vlgmr.msra.gmra.mrb[14].mxu0 %vm34_vm0, %v4206_v20  ;;  %3408 = vmatmul.mubr.msk.f32.vlgmr.msra.gmra.mrb[12].mxu1 %vm34_vm0, %v4206_v20 }
 0xe0c   :  { %3633 = vmatpush3.bf16.msra.mxu0 %v3630_v56  ;;  %3396 = vmatprep.mubr.msk.f32.mxu0 %vm34_vm0, %v4204_v19 }
 0xe0d   :  { %3635 = vmatprep.subr.bf16.mxu0 %v3634_v22 }
 0xe10   :  { %3637 = vmatpush3.bf16.msra.mxu0 %v3634_v22 }
 0xe13   :  { %3397 = vmatmul.mubr.msk.f32.vlgmr.msra.gmra.mrb[16].mxu0 %vm34_vm0, %v4206_v20 }
 0xede   :  { %v3387_v24 = vpop.f32.mrb[14].mxu0  ;;  %v3409_v16 = vpop.f32.mrb[12].mxu1 }
 0xedf   :  { %v1722_v13 = vadd.f32 %v3409_v16, %v1649_v14  ;;  %v1548_v10 = vpop.f32.mrb[15].mxu0  ;;  %v1716_v25 = vpop.f32.mrb[13].mxu1  ;;  %v1554_v36 = vadd.f32 %v3387_v24, %v1475_v23 }
 0xee0   :  { %v1549_v51 = vadd.f32 %v1548_v10, %v1475_v23  ;;  %v1717_v46 = vadd.f32 %v1716_v25, %v1649_v14 }
 0xee2   :  { %v3652_v26 = vpack.c.bf16 %v1722_v13, %v1717_v46  ;;  %3414 = vmatprep.mubr.msk.f32.mxu0 %vm331_vm1, %v1549_v51  ;;  %v3035_v51 = vld [vmem:[%s4429_s3 + $0x20] sm:$0xff]  ;;  %v3036_v46 = vld [vmem:[%s4429_s3 + $0x28] sm:$0xff] }
 0xee4   :  { %3653 = vmatprep.subr.bf16.mxu1 %v3652_v26 }
 0xee5   :  { %3655 = vmatpush3.bf16.msra.mxu1 %v3652_v26  ;;  %v3656_v26 = vpack.c.bf16 %v3036_v46, %v3035_v51  ;;  %v2006_v51 = vrot.slane %v4223_v38, %v3926_v39 }
 0xee6   :  { %v3398_v27 = vpop.f32.mrb[16].mxu0 }
 0xee7   :  { %v1638_v28 = vadd.f32 %v3398_v27, %v1565_v54  ;;  %v1632_v29 = vpop.f32.mrb[17].mxu0  ;;  %3657 = vmatprep.subr.bf16.mxu1 %v3656_v26 }
 0xee8   :  { %v1633_v52 = vadd.f32 %v1632_v29, %v1565_v54 }
 0xeea   :  { %v3646_v50 = vpack.c.bf16 %v1638_v28, %v1633_v52  ;;  %v3045_v52 = vld [vmem:[%s4428_s2 + $0x140] sm:$0xff] }
 0xeec   :  { %3648 = vmatprep.subr.msk.bf16.mxu0 %vm3974_vm2, %v3646_v50 }
 0xeed   :  { %3651 = vmatpush3.bf16.xpose.msk.msra.mxu0 %vm3974_vm2, %v3646_v50  ;;  %v3046_v50 = vld [vmem:[%s4428_s2 + $0x148] sm:$0xff] }
 0xeee   :  { %3661 = vmatprep.subr.bf16.mxu0 %v3660_v32 }
 0xef4   :  { %3415 = vmatmul.mubr.msk.f32.vlgmr.msra.gmra.mrb[18].mxu0 %vm331_vm1, %v1554_v36 }
 0xef5   :  { %3663 = vmatpush3.bf16.msra.mxu0 %v3660_v32  ;;  %3439 = vmatprep.mubr.msk.f32.mxu0 %vm34_vm0, %v4204_v19  ;;  %v3668_v32 = vpack.c.bf16 %v3046_v50, %v3045_v52 }
 0xef6   :  { %3665 = vmatprep.subr.bf16.mxu0 %v3664_v40 }
 0xef9   :  { %3667 = vmatpush3.bf16.msra.mxu0 %v3664_v40 }
 0xefa   :  { %3677 = vmatprep.subr.bf16.mxu0 %v3676_v43 }
 0xefc   :  { %3440 = vmatmul.mubr.msk.f32.vlgmr.msra.gmra.mrb[20].mxu0 %vm34_vm0, %v4206_v20 }
 0xefd   :  { %3679 = vmatpush3.bf16.msra.mxu0 %v3676_v43  ;;  %3461 = vmatprep.mubr.msk.f32.mxu0 %vm34_vm0, %v4204_v19  ;;  %v2101_v43 = vrot.slane %v4223_v38, %v4069_v21 }
 0xefe   :  { %3681 = vmatprep.subr.bf16.mxu0 %v3680_v47 }
 0xf01   :  { %3683 = vmatpush3.bf16.msra.mxu0 %v3680_v47 }
 0xf04   :  { %3462 = vmatmul.mubr.msk.f32.vlgmr.msra.gmra.mrb[22].mxu0 %vm34_vm0, %v4206_v20 }
 0xfc7   :  { %v3416_v48 = vpop.f32.mrb[18].mxu0 }
 0xfc8   :  { %v1813_v49 = vmul.f32 0.25, %v3416_v48  ;;  %v1803_v56 = vpop.f32.mrb[19].mxu0 }
 0xfc9   :  { %v1812_v57 = vmul.f32 0.25, %v1803_v56 }
 0xfca   :  { %v1815_v58 = vadd.f32 %v1813_v49, %v3989_v12 }
 0xfcb   :  { %v1814_v59 = vadd.f32 %v1812_v57, %v3994_v15 }
 0xfcc   :  { %v1819_v60 = vsel %vm331_vm1, %v1815_v58, -inf }
 0xfcd   :  { %1820 = vmax.xlane.f32.xlu1 %v1819_v60  ;;  %v1816_v62 = vsel %vm331_vm1, %v1814_v59, -inf }
 0xfce   :  { %1817 = vmax.xlane.f32.xlu0 %v1816_v62 }
 0xfcf   :  { %v3441_v0 = vpop.f32.mrb[20].mxu0 }
 0xfd0   :  { %v4275_v1 = vadd.f32 %v3441_v0, %v2017_v61  ;;  %v2084_v3 = vpop.f32.mrb[21].mxu0 }
 0xfd1   :  { %v2085_v42 = vadd.f32 %v2084_v3, %v2017_v61 }
 0xfd7   :  { %v3463_v5 = vpop.f32.mrb[22].mxu0 }
 0xfd8   :  { %v2258_v8 = vadd.f32 %v3463_v5, %v2185_v4  ;;  %v2252_v9 = vpop.f32.mrb[23].mxu0 }
 0xfd9   :  { %v2253_v11 = vadd.f32 %v2252_v9, %v2185_v4 }
 0xfdb   :  { %v3690_v17 = vpack.c.bf16 %v2258_v8, %v2253_v11 }
 0xfdd   :  { %3691 = vmatprep.subr.bf16.mxu0 %v3690_v17 }
 0xfde   :  { %3693 = vmatpush3.bf16.msra.mxu0 %v3690_v17  ;;  %v3063_v17 = vld [vmem:[%s4429_s3 + $0x30] sm:$0xff] }
0x105a   :  { %v1821_v18 = vpop.xlane.xlu1 %1820 }
0x105b   :  { %v1823_v22 = vsub.f32 %v1815_v58, %v1821_v18  ;;  %v1818_v14 = vpop.xlane.xlu0 %1817  ;;  %v3064_v18 = vld [vmem:[%s4429_s3 + $0x38] sm:$0xff] }
0x105c   :  { %v1822_v23 = vsub.f32 %v1814_v59, %v1818_v14 }
0x105d   :  { %v1826_v24 = vmul.f32 1.442695, %v1823_v22  ;;  %v3694_v22 = vpack.c.bf16 %v3064_v18, %v3063_v17  ;;  %v3077_v18 = vld [vmem:[%s4431_s5 + $0x60] sm:$0xff] }
0x105e   :  { %v1824_v16 = vmul.f32 1.442695, %v1822_v23 }
0x105f   :  { %3773 = vpow2.f32 %v1826_v24 }
0x1060   :  { %3775 = vpow2.f32 %v1824_v16 }
0x1069   :  { %v3774_v13 = vpop.eup %3773 }
0x106a   :  { %v3776_v10 = vpop.eup %3775  ;;  %v1831_v25 = vsel %vm331_vm1, %v3774_v13, 0.0 }
0x106b   :  { %1832 = vadd.xlane.f32.xlu1 %v1831_v25  ;;  %v1828_v37 = vsel %vm331_vm1, %v3776_v10, 0.0 }
0x106c   :  { %1829 = vadd.xlane.f32.xlu0 %v1828_v37 }
0x10f8   :  { %v1833_v54 = vpop.xlane.xlu1 %1832 }
0x10f9   :  { %3777 = vrcp.f32 %v1833_v54  ;;  %v1830_v27 = vpop.xlane.xlu0 %1829 }
0x10fa   :  { %3779 = vrcp.f32 %v1830_v27 }
0x1103   :  { %v3778_v28 = vpop.eup %3777 }
0x1104   :  { %v3780_v29 = vpop.eup %3779  ;;  %v1837_v31 = vmul.f32 %v3778_v28, %v3774_v13 }
0x1105   :  { %v1835_v30 = vmul.f32 %v3780_v29, %v3776_v10 }
0x1107   :  { %3421 = vmatprep.mubr.msk.f32.mxu1 %vm331_vm1, %v1835_v30 }
0x1108   :  { %3422 = vmatmul.mubr.msk.f32.vlgmr.msra.gmra.mrb[14].mxu1 %vm331_vm1, %v1837_v31 }
0x1109   :  { %3659 = vmatpush3.bf16.msra.mxu1 %v3656_v26 }
0x110a   :  { %3669 = vmatprep.subr.bf16.mxu1 %v3668_v32 }
0x11db   :  { %v3423_v36 = vpop.f32.mrb[14].mxu1 }
0x11dc   :  { %v1910_v40 = vpop.f32.mrb[15].mxu1 }
0x11dd   :  { %3428 = vmatprep.mubr.msk.f32.mxu1 %vm331_vm1, %v1910_v40 }
0x11de   :  { %3429 = vmatmul.mubr.msk.f32.vlgmr.msra.gmra.mrb[16].mxu1 %vm331_vm1, %v3423_v36 }
0x11df   :  { %3671 = vmatpush3.bf16.msra.mxu1 %v3668_v32  ;;  %3450 = vmatprep.mubr.msk.f32.mxu1 %vm34_vm0, %v4204_v19 }
0x11e0   :  { %3673 = vmatprep.subr.bf16.mxu1 %v3672_v41 }
0x11e3   :  { %3675 = vmatpush3.bf16.msra.mxu1 %v3672_v41 }
0x11e6   :  { %3451 = vmatmul.mubr.msk.f32.vlgmr.msra.gmra.mrb[18].mxu1 %vm34_vm0, %v4206_v20 }
0x11e7   :  { %3468 = vmatprep.mubr.msk.f32.mxu1 %vm331_vm1, %v2085_v42  ;;  %v3068_v42 = vld [vmem:[%s4430_s4 + $0x28] sm:$0xff] }
0x12b9   :  { %v3452_v44 = vpop.f32.mrb[18].mxu1 }
0x12ba   :  { %v2174_v45 = vadd.f32 %v3452_v44, %v2101_v43  ;;  %v2168_v47 = vpop.f32.mrb[19].mxu1  ;;  %v3069_v44 = vld [vmem:[%s4430_s4 + $0x30] sm:$0xff] }
0x12bb   :  { %v2169_v48 = vadd.f32 %v2168_v47, %v2101_v43 }
0x12bd   :  { %v3684_v49 = vpack.c.bf16 %v2174_v45, %v2169_v48  ;;  %v3070_v45 = vld [vmem:[%s4430_s4 + $0x38] sm:$0xff] }
0x12be   :  { %v3702_v47 = vpack.c.bf16 %v3070_v45, %v3069_v44 }
0x12bf   :  { %3686 = vmatprep.subr.msk.bf16.mxu1 %vm3974_vm2, %v3684_v49 }
0x12c0   :  { %3689 = vmatpush3.bf16.xpose.msk.msra.mxu1 %vm3974_vm2, %v3684_v49 }
0x12c1   :  { %3695 = vmatprep.subr.bf16.mxu1 %v3694_v22 }
0x12c7   :  { %3469 = vmatmul.mubr.msk.f32.vlgmr.msra.gmra.mrb[20].mxu1 %vm331_vm1, %v4275_v1 }
0x12c8   :  { %3697 = vmatpush3.bf16.msra.mxu1 %v3694_v22  ;;  %v3078_v22 = vld [vmem:[%s4431_s5 + $0x68] sm:$0xff] }
0x139a   :  { %v3470_v56 = vpop.f32.mrb[20].mxu1 }
0x139b   :  { %v2349_v57 = vmul.f32 0.25, %v3470_v56  ;;  %v2339_v58 = vpop.f32.mrb[21].mxu1 }
0x139c   :  { %v2348_v59 = vmul.f32 0.25, %v2339_v58 }
0x139d   :  { %v2351_v60 = vadd.f32 %v2349_v57, %v3989_v12 }
0x139e   :  { %v2350_v61 = vadd.f32 %v2348_v59, %v3994_v15 }
0x139f   :  { %v2355_v62 = vsel %vm331_vm1, %v2351_v60, -inf }
0x13a0   :  { %2356 = vmax.xlane.f32.xlu1 %v2355_v62  ;;  %v2352_v0 = vsel %vm331_vm1, %v2350_v61, -inf }
0x13a1   :  { %2353 = vmax.xlane.f32.xlu0 %v2352_v0 }
0x142d   :  { %v2357_v3 = vpop.xlane.xlu1 %2356 }
0x142e   :  { %v2359_v2 = vsub.f32 %v2351_v60, %v2357_v3  ;;  %v2354_v4 = vpop.xlane.xlu0 %2353  ;;  %v4355_v60 = vld [vmem:[%s4432_s6 + $0x18] sm:$0xff] }
0x142f   :  { %v2358_v5 = vsub.f32 %v2350_v61, %v2354_v4  ;;  %v2572_v61 = vrot.slane %v4355_v60, %v3955_v53  ;;  %v2578_v4 = vrot.slane %v4355_v60, %v3970_v63  ;;  %v3073_v53 = vld [vmem:[%s4431_s5 + $0x40] sm:$0xff]  ;;  %v3074_v63 = vld [vmem:[%s4431_s5 + $0x48] sm:$0xff] }
0x1430   :  { %v2362_v8 = vmul.f32 1.442695, %v2359_v2 }
0x1431   :  { %v2360_v1 = vmul.f32 1.442695, %v2358_v5 }
0x1432   :  { %3781 = vpow2.f32 %v2362_v8 }
0x1433   :  { %3783 = vpow2.f32 %v2360_v1 }
0x143c   :  { %v3782_v9 = vpop.eup %3781 }
0x143d   :  { %v3784_v11 = vpop.eup %3783  ;;  %v2367_v12 = vsel %vm331_vm1, %v3782_v9, 0.0 }
0x143e   :  { %2368 = vadd.xlane.f32.xlu1 %v2367_v12  ;;  %v2364_v15 = vsel %vm331_vm1, %v3784_v11, 0.0  ;;  %v3075_v12 = vld [vmem:[%s4431_s5 + $0x50] sm:$0xff] }
0x143f   :  { %2365 = vadd.xlane.f32.xlu0 %v2364_v15  ;;  %v3076_v15 = vld [vmem:[%s4431_s5 + $0x58] sm:$0xff] }
0x1440   :  { %v3710_v17 = vpack.c.bf16 %v3076_v15, %v3075_v12 }
0x14cb   :  { %v2369_v14 = vpop.xlane.xlu1 %2368 }
0x14cc   :  { %3785 = vrcp.f32 %v2369_v14  ;;  %v2366_v23 = vpop.xlane.xlu0 %2365  ;;  %v3714_v14 = vpack.c.bf16 %v3078_v22, %v3077_v18 }
0x14cd   :  { %3787 = vrcp.f32 %v2366_v23  ;;  %v3079_v23 = vld [vmem:[%s4431_s5 + $0x70] sm:$0xff] }
0x14d6   :  { %v3786_v24 = vpop.eup %3785 }
0x14d7   :  { %v3788_v16 = vpop.eup %3787  ;;  %v2373_v10 = vmul.f32 %v3786_v24, %v3782_v9  ;;  %v3080_v24 = vld [vmem:[%s4431_s5 + $0x78] sm:$0xff] }
0x14d8   :  { %v2371_v13 = vmul.f32 %v3788_v16, %v3784_v11  ;;  %v3706_v11 = vpack.c.bf16 %v3074_v63, %v3073_v53  ;;  %v3718_v16 = vpack.c.bf16 %v3080_v24, %v3079_v23  ;;  %v2737_v23 = vrot.slane %v4355_v60, %v3963_v55 }
0x14da   :  { %3475 = vmatprep.mubr.msk.f32.mxu0 %vm331_vm1, %v2371_v13  ;;  %3707 = vmatprep.subr.bf16.mxu1 %v3706_v11  ;;  %v2589_v13 = vrot.slane %v4223_v38, %v1193_v6 }
0x14db   :  { %3476 = vmatmul.mubr.msk.f32.vlgmr.msra.gmra.mrb[24].mxu0 %vm331_vm1, %v2373_v10 }
0x15ae   :  { %v3477_v25 = vpop.f32.mrb[24].mxu0 }
0x15af   :  { %v2446_v37 = vpop.f32.mrb[25].mxu0 }
0x15b0   :  { %3482 = vmatprep.mubr.msk.f32.mxu1 %vm331_vm1, %v2446_v37 }
0x15b1   :  { %3483 = vmatmul.mubr.msk.f32.vlgmr.msra.gmra.mrb[16].mxu1 %vm331_vm1, %v3477_v25 }
0x15b2   :  { %3709 = vmatpush3.bf16.msra.mxu1 %v3706_v11 }
0x15b3   :  { %3711 = vmatprep.subr.bf16.mxu1 %v3710_v17 }
0x15b6   :  { %3713 = vmatpush3.bf16.msra.mxu1 %v3710_v17 }
0x15b7   :  { %3715 = vmatprep.subr.bf16.mxu1 %v3714_v14 }
0x15ba   :  { %3717 = vmatpush3.bf16.msra.mxu1 %v3714_v14 }
0x15bb   :  { %3719 = vmatprep.subr.bf16.mxu1 %v3718_v16 }
0x15be   :  { %3721 = vmatpush3.bf16.msra.mxu1 %v3718_v16 }
0x1684   :  { %v3484_v46 = vpop.f32.mrb[16].mxu1 }
0x1685   :  { %v3727_v26 = vadd.f32 %v3484_v46, %v2006_v51  ;;  %v2530_v54 = vpop.f32.mrb[17].mxu1 }
0x1686   :  { %v3728_v27 = vadd.f32 %v2530_v54, %v2006_v51 }
0x1687   :  { %v2542_v28 = vadd.f32 %v3727_v26, %v4206_v20 }
0x1688   :  { %v2541_v29 = vadd.f32 %v3728_v27, %v4204_v19  ;;  %v3067_v19 = vld [vmem:[%s4430_s4 + $0x20] sm:$0xff] }
0x1689   :  { %v2546_v30 = vsel %vm34_vm0, %v2542_v28, 0.0  ;;  %v3698_v43 = vpack.c.bf16 %v3068_v42, %v3067_v19 }
0x168a   :  { %2547 = vadd.xlane.f32.xlu1 %v2546_v30  ;;  %v2543_v31 = vsel %vm34_vm0, %v2541_v29, 0.0 }
0x168b   :  { %2544 = vadd.xlane.f32.xlu0 %v2543_v31  ;;  %3699 = vmatprep.subr.bf16.mxu0 %v3698_v43 }
0x168c   :  { %3701 = vmatpush3.bf16.msra.mxu0 %v3698_v43 }
0x168d   :  { %3703 = vmatprep.subr.bf16.mxu0 %v3702_v47 }
0x1690   :  { %3705 = vmatpush3.bf16.msra.mxu0 %v3702_v47 }
0x1717   :  { %v2548_v52 = vpop.xlane.xlu1 %2547 }
0x1718   :  { %v2550_v50 = vmul.f32 0.03125, %v2548_v52  ;;  %v2545_v32 = vpop.xlane.xlu0 %2544 }
0x1719   :  { %v2549_v33 = vmul.f32 0.03125, %v2545_v32 }
0x171a   :  { %v2552_v34 = vsub.f32 %v2542_v28, %v2550_v50 }
0x171b   :  { %v2551_v39 = vsub.f32 %v2541_v29, %v2549_v33 }
0x171c   :  { %v2554_v36 = vmul.f32 %v2552_v34, %v2552_v34 }
0x171d   :  { %v2553_v40 = vmul.f32 %v2551_v39, %v2551_v39 }
0x171e   :  { %v2558_v41 = vsel %vm34_vm0, %v2554_v36, 0.0 }
0x171f   :  { %2559 = vadd.xlane.f32.xlu1 %v2558_v41  ;;  %v2555_v20 = vsel %vm34_vm0, %v2553_v40, 0.0 }
0x1720   :  { %2556 = vadd.xlane.f32.xlu0 %v2555_v20 }
0x17ac   :  { %v2560_v48 = vpop.xlane.xlu1 %2559 }
0x17ad   :  { %v2562_v49 = vmul.f32 0.03125, %v2560_v48  ;;  %v2557_v56 = vpop.xlane.xlu0 %2556 }
0x17ae   :  { %v2561_v57 = vmul.f32 0.03125, %v2557_v56 }
0x17af   :  { %v2564_v58 = vadd.f32 1e-12, %v2562_v49 }
0x17b0   :  { %v2563_v59 = vadd.f32 1e-12, %v2561_v57 }
0x17b1   :  { %3789 = vrsqrt.f32 %v2564_v58 }
0x17b2   :  { %3791 = vrsqrt.f32 %v2563_v59 }
0x17bb   :  { %v3790_v62 = vpop.eup %3789 }
0x17bc   :  { %v3792_v0 = vpop.eup %3791  ;;  %v2568_v3 = vmul.f32 %v3790_v62, %v2552_v34 }
0x17bd   :  { %v2567_v2 = vmul.f32 %v3792_v0, %v2551_v39 }
0x17be   :  { %v2574_v5 = vmul.f32 %v2572_v61, %v2568_v3 }
0x17bf   :  { %v2573_v8 = vmul.f32 %v2572_v61, %v2567_v2 }
0x17c0   :  { %v4363_v9 = vadd.f32 %v2578_v4, %v2574_v5 }
0x17c1   :  { %v4361_v1 = vadd.f32 %v2578_v4, %v2573_v8 }
0x17c3   :  { %3493 = vmatprep.mubr.msk.f32.mxu0 %vm34_vm0, %v4361_v1 }
0x17c4   :  { %3494 = vmatmul.mubr.msk.f32.vlgmr.msra.gmra.mrb[26].mxu0 %vm34_vm0, %v4363_v9 }
0x1897   :  { %v3495_v10 = vpop.f32.mrb[26].mxu0 }
0x1898   :  { %v2668_v25 = vadd.f32 %v3495_v10, %v2589_v13  ;;  %v2662_v37 = vpop.f32.mrb[27].mxu0 }
0x1899   :  { %v2663_v51 = vadd.f32 %v2662_v37, %v2589_v13 }
0x189a   :  { %v2672_v46 = vmul.f32 0.70710677, %v2668_v25  ;;  %v2720_v18 = vmul.f32 0.5, %v2668_v25 }
0x189b   :  { %v2671_v26 = vmul.f32 0.70710677, %v2663_v51  ;;  %v2719_v15 = vmul.f32 0.5, %v2663_v51 }
0x189c   :  { %v2674_v54 = vand.u32 2147483647, %v2672_v46  ;;  %vm2714_vm6 = vcmp.lt.f32.partialorder %v2672_v46, 0.0 }
0x189d   :  { %v2673_v27 = vand.u32 2147483647, %v2671_v26  ;;  %vm2713_vm7 = vcmp.lt.f32.partialorder %v2671_v26, 0.0 }
0x189e   :  { %v2676_v28 = vmul.f32 0.3275911, %v2674_v54  ;;  %v2702_v52 = vsub.f32 0.0, %v2674_v54 }
0x189f   :  { %v2675_v29 = vmul.f32 0.3275911, %v2673_v27  ;;  %v2701_v50 = vsub.f32 0.0, %v2673_v27 }
0x18a0   :  { %v2678_v30 = vadd.f32 1.0, %v2676_v28  ;;  %v2704_v35 = vmul.f32 %v2702_v52, %v2674_v54 }
0x18a1   :  { %v2677_v31 = vadd.f32 1.0, %v2675_v29  ;;  %v2703_v38 = vmul.f32 %v2701_v50, %v2673_v27  ;;  %v3833_v50 = vmov 0.0  }
0x18a2   :  { %3793 = vrcp.f32 %v2678_v30  ;;  %v2707_v36 = vmul.f32 1.442695, %v2704_v35  ;;  %3519 = vmatprep.mubr.msk.f32.mxu0 %vm3832_vm8, %v3833_v50 }
0x18a3   :  { %3795 = vrcp.f32 %v2677_v31  ;;  %v2705_v20 = vmul.f32 1.442695, %v2703_v38 }
0x18a4   :  { %3797 = vpow2.f32 %v2707_v36 }
0x18a5   :  { %3799 = vpow2.f32 %v2705_v20 }
0x18ac   :  { %v3794_v32 = vpop.eup %3793 }
0x18ad   :  { %v3796_v33 = vpop.eup %3795  ;;  %v2684_v6 = vmul.f32 1.0614054, %v3794_v32 }
0x18ae   :  { %v2683_v34 = vmul.f32 1.0614054, %v3796_v33  ;;  %v3798_v61 = vpop.eup %3797 }
0x18af   :  { %v2686_v39 = vadd.f32 -1.4531521, %v2684_v6  ;;  %v3800_v0 = vpop.eup %3799 }
0x18b0   :  { %v2685_v40 = vadd.f32 -1.4531521, %v2683_v34 }
0x18b1   :  { %v2688_v41 = vmul.f32 %v3794_v32, %v2686_v39 }
0x18b2   :  { %v2687_v19 = vmul.f32 %v3796_v33, %v2685_v40  ;;  %v2850_v40 = vrot.slane %v4355_v60, %v4055_v7 }
0x18b3   :  { %v2690_v42 = vadd.f32 1.4214138, %v2688_v41 }
0x18b4   :  { %v2689_v43 = vadd.f32 1.4214138, %v2687_v19 }
0x18b5   :  { %v2692_v44 = vmul.f32 %v3794_v32, %v2690_v42  ;;  %v2856_v42 = vrot.slane %v4355_v60, %v4069_v21 }
0x18b6   :  { %v2691_v45 = vmul.f32 %v3796_v33, %v2689_v43 }
0x18b7   :  { %v2694_v47 = vadd.f32 -0.28449672, %v2692_v44 }
0x18b8   :  { %v2693_v48 = vadd.f32 -0.28449672, %v2691_v45 }
0x18b9   :  { %v2696_v49 = vmul.f32 %v3794_v32, %v2694_v47 }
0x18ba   :  { %v2695_v56 = vmul.f32 %v3796_v33, %v2693_v48 }
0x18bb   :  { %v2698_v57 = vadd.f32 0.2548296, %v2696_v49 }
0x18bc   :  { %v2697_v58 = vadd.f32 0.2548296, %v2695_v56 }
0x18bd   :  { %v2700_v59 = vmul.f32 %v3794_v32, %v2698_v57  ;;  %v29_v32 = vld [vmem:[%s4427_s1 + $0x10] sm:$0x3]  ;;  %s3834_s1 = smov [#allocation2]  }
0x18be   :  { %v2699_v62 = vmul.f32 %v3796_v33, %v2697_v58  ;;  %v2933_v35 = vsel %vm2932_vm9, %v29_v32, 0.0  ;;  %s2947_s0 = sshll.u32 %s3834_s1, 4  ;;  %s2948_s0 = int_to_ptr.vmem [resolvable:$true] %s2947_s0 }
0x18bf   :  { %v2710_v3 = vmul.f32 %v3798_v61, %v2700_v59  ;;  %s3807_s3 = scalar_lea.vmem %s2948_s0, 32  ;;  %p3812_p1 = scmp.lt.s32.totalorder %s2948_s0, %s2948_s0 }
0x18c0   :  { %v2709_v2 = vmul.f32 %v3800_v0, %v2699_v62  ;;  %p3808_p0 = scmp.ne.s32.totalorder %s2948_s0, %s3807_s3  ;;  %p3813_p2 = scmp.lt.s32.totalorder %s3807_s3, %s3807_s3 }
0x18c1   :  { %v2712_v4 = vsub.f32 1.0, %v2710_v3 }
0x18c2   :  { %v2711_v5 = vsub.f32 1.0, %v2709_v2  ;;  %p3814_p3 = por %p3813_p2, %p3812_p1 }
0x18c3   :  { %v2716_v8 = vsub.f32 0.0, %v2712_v4 }
0x18c4   :  { %v2715_v53 = vsub.f32 0.0, %v2711_v5  ;;  %p3815_p4 = pnand %p3814_p3, %p3808_p0 }
0x18c5   :  { %v2718_v63 = vsel %vm2714_vm6, %v2716_v8, %v2712_v4 }
0x18c6   :  { %v2722_v11 = vadd.f32 1.0, %v2718_v63  ;;  %v2717_v12 = vsel %vm2713_vm7, %v2715_v53, %v2711_v5 }
0x18c7   :  { %v2721_v17 = vadd.f32 1.0, %v2717_v12 }
0x18c8   :  { %v2724_v14 = vmul.f32 %v2722_v11, %v2720_v18 }
0x18c9   :  { %v2723_v22 = vmul.f32 %v2721_v17, %v2719_v15 }
0x18cb   :  { %3512 = vmatprep.mubr.msk.f32.mxu1 %vm1342_vm5, %v2723_v22 }
0x18cc   :  { %3513 = vmatmul.mubr.msk.f32.vlgmr.msra.gmra.mrb[22].mxu1 %vm1342_vm5, %v2724_v14 }
0x199f   :  { %v3514_v24 = vpop.f32.mrb[22].mxu1 }
0x19a0   :  { %v2816_v16 = vadd.f32 %v3514_v24, %v2737_v23  ;;  %v2810_v13 = vpop.f32.mrb[23].mxu1 }
0x19a1   :  { %v2811_v10 = vadd.f32 %v2810_v13, %v2737_v23 }
0x19a2   :  { %v2820_v37 = vadd.f32 %v2816_v16, %v4363_v9 }
0x19a3   :  { %v2819_v46 = vadd.f32 %v2811_v10, %v4361_v1  ;;  %v3831_v1 = vmov 0.0|0.0  }
0x19a4   :  { %v2824_v51 = vsel %vm34_vm0, %v2820_v37, 0.0  ;;  %3722 = vmatprep.subr.bf16.mxu0 %v3831_v1 }
0x19a5   :  { %2825 = vadd.xlane.f32.xlu1 %v2824_v51  ;;  %v2821_v25 = vsel %vm34_vm0, %v2819_v46, 0.0 }
0x19a6   :  { %2822 = vadd.xlane.f32.xlu0 %v2821_v25 }
0x1a32   :  { %v2826_v26 = vpop.xlane.xlu1 %2825 }
0x1a33   :  { %v2828_v54 = vmul.f32 0.03125, %v2826_v26  ;;  %v2823_v27 = vpop.xlane.xlu0 %2822 }
0x1a34   :  { %v2827_v28 = vmul.f32 0.03125, %v2823_v27 }
0x1a35   :  { %v2830_v29 = vsub.f32 %v2820_v37, %v2828_v54 }
0x1a36   :  { %v2829_v55 = vsub.f32 %v2819_v46, %v2827_v28 }
0x1a37   :  { %v2832_v30 = vmul.f32 %v2830_v29, %v2830_v29 }
0x1a38   :  { %v2831_v31 = vmul.f32 %v2829_v55, %v2829_v55 }
0x1a39   :  { %v2836_v52 = vsel %vm34_vm0, %v2832_v30, 0.0 }
0x1a3a   :  { %2837 = vadd.xlane.f32.xlu1 %v2836_v52  ;;  %v2833_v9 = vsel %vm34_vm0, %v2831_v31, 0.0 }
0x1a3b   :  { %2834 = vadd.xlane.f32.xlu0 %v2833_v9 }
0x1a3f   :  { %2934 = vadd.xlane.f32.xlu0 %v2933_v35 }
0x1ac7   :  { %v2838_v33 = vpop.xlane.xlu1 %2837 }
0x1ac8   :  { %v2840_v6 = vmul.f32 0.03125, %v2838_v33  ;;  %v2835_v38 = vpop.xlane.xlu0 %2834 }
0x1ac9   :  { %v2839_v34 = vmul.f32 0.03125, %v2835_v38 }
0x1aca   :  { %v2842_v39 = vadd.f32 1e-12, %v2840_v6 }
0x1acb   :  { %v2841_v36 = vadd.f32 1e-12, %v2839_v34 }
0x1acc   :  { %3801 = vrsqrt.f32 %v2842_v39  ;;  %v2935_v56 = vpop.xlane.xlu0 %2934 }
0x1acd   :  { %3803 = vrsqrt.f32 %v2841_v36  ;;  %v2936_v57 = vmax.f32 %v2935_v56, 1.0 }
0x1acf   :  { %3805 = vrcp.f32 %v2936_v57 }
0x1ad6   :  { %v3802_v41 = vpop.eup %3801 }
0x1ad7   :  { %v3804_v20 = vpop.eup %3803  ;;  %v2846_v19 = vmul.f32 %v3802_v41, %v2830_v29 }
0x1ad8   :  { %v2845_v43 = vmul.f32 %v3804_v20, %v2829_v55 }
0x1ad9   :  { %v2852_v44 = vmul.f32 %v2850_v40, %v2846_v19  ;;  %v3806_v58 = vpop.eup %3805 }
0x1ada   :  { %v2851_v45 = vmul.f32 %v2850_v40, %v2845_v43 }
0x1adb   :  { %v2858_v47 = vadd.f32 %v2856_v42, %v2852_v44 }
0x1adc   :  { %v2857_v48 = vadd.f32 %v2856_v42, %v2851_v45 }
0x1ade   :  { %v3723_v49 = vpack.c.bf16 %v2858_v47, %v2857_v48 }
0x1ae0   :  { %3724 = vmatpush3.bf16.msra.mxu0 %v3723_v49 }
0x1ae3   :  { %3520 = vmatmul.mubr.msk.f32.vlgmr.msra.gmra.mrb[28].mxu0 %vm331_vm1, %v29_v32 }
0x1bb6   :  { %v2928_v7 = vpop.f32.mrb[28].mxu0 }
0x1bb7   :  { %v2938_v59 = vmul.f32 %v3806_v58, %v2928_v7  ;;  %v3521_v61 = vpop.f32.mrb[29].mxu0 }
0x1bb9   :  { %2940 = vst.msk [vmem:[#allocation2] sm:$0x3] %vm2939_vm10, %v2938_v59 }
0x1bba   :  { %3818 = shalt.err (!%p3815_p4)
}
0x1bbb   :  { %s3819_s30 = scalar_lea.hbm %s4433_s7, 32 }
0x1bbc   :  { %p3820_p5 = scmp.ne.s32.totalorder %s4433_s7, %s3819_s30  ;;  %p3823_p6 = scmp.lt.u32.totalorder %s3819_s30, %s4433_s7 }
0x1bbe   :  { %p3825_p7 = pnand %p3823_p6, %p3820_p5 }
0x1bc0   :  { %3828 = shalt.err (!%p3825_p7)
}
0x1bc1   :  { %2950 = dma.vmem_to_hbm [thread:$0]  %s2948_s0, 32, %s4433_s7, [#allocation3]  }
0x1bc2   :  { %3829 = dma.done.wait [#allocation3], 32  }
0x1bc3   :  { %3830 = vsyncadd [#allocation3], 4294967264 }
0x1bc4   :  { %2954 = vsyncpa [#allocation3], 1 }

</bundles_post_ra>
